<compile_context>
chip_gen: v7x
topology: tpu7x:2x2x1
jax: 0.10.0
libtpu: 0.0.40
codegen_flags: <defaults>
</compile_context>

<pallas_src>
import functools

import jax
import jax.numpy as jnp
from jax.experimental import pallas as pl
from jax.experimental.pallas import tpu as pltpu


# ---------------------------------------------------------------------------
# Fused kernel: full ConvBlock forward for ONE batch element, all in VMEM.
# ---------------------------------------------------------------------------
def _make_fused_kernel(num_layers):
    def kernel(x_ref, *refs):
        o_ref = refs[-1]
        p_refs = refs[:-1]

        # Current activation, flattened to (Cin * Hpad, Wpad).
        a = x_ref[0].astype(jnp.float32)

        idx = 0
        for l in range(num_layers):
            l_ref = p_refs[idx]        # (kw, Cout*Hout, Cin*Hpad)  weights + row taps
            r_ref = p_refs[idx + 1]    # (kw, Wpad, Wout)           column taps (0/1)
            b_ref = p_refs[idx + 2]    # (Cout*Hout, 1)             bias
            idx += 3
            kw = l_ref.shape[0]

            acc = None
            for j in range(kw):        # sum of kw matmul pairs on the MXU
                t = jnp.dot(a, r_ref[j], preferred_element_type=jnp.float32)
                term = jnp.dot(l_ref[j], t, preferred_element_type=jnp.float32)
                acc = term if acc is None else acc + term

            act = jnp.maximum(acc + b_ref[...], 0.0)        # bias + ReLU (f32 epilogue)

            if l < num_layers - 1:
                # Zero-pad + flatten for the next layer, again as 0/1 matmuls.
                pr_ref = p_refs[idx]       # (Cout*Hpad', Cout*Hout)
                pc_ref = p_refs[idx + 1]   # (Wout, Wpad')
                idx += 2
                a = jnp.dot(
                    pr_ref[...],
                    jnp.dot(act, pc_ref[...], preferred_element_type=jnp.float32),
                    preferred_element_type=jnp.float32)
            else:
                o_ref[0] = act.astype(o_ref.dtype)

    return kernel


# ---------------------------------------------------------------------------
# Glue: fold conv weights / stride / padding into 2D matmul operands.
# ---------------------------------------------------------------------------
def _layer_matrices(w, b, stride, pad, hin, win):
    cout, cin, kh, kw = w.shape
    hp, wp = hin + 2 * pad, win + 2 * pad
    hout = (hp - kh) // stride + 1
    wout = (wp - kw) // stride + 1

    # RH[i, h, r] = 1  iff  r == stride*h + i   (row-tap selection)
    i_idx = jnp.arange(kh)[:, None, None]
    h_idx = jnp.arange(hout)[None, :, None]
    r_idx = jnp.arange(hp)[None, None, :]
    rh = (r_idx == stride * h_idx + i_idx).astype(jnp.float32)      # (kh, hout, hp)

    # L[j, co*hout + h, c*hp + r] = W[co, c, r - stride*h, j] (0 outside taps)
    lmat = jnp.einsum('ocij,ihr->johcr', w.astype(jnp.float32), rh)
    lmat = lmat.reshape(kw, cout * hout, cin * hp)

    # RW[j, q, w] = 1  iff  q == stride*w + j   (column-tap selection)
    j_idx = jnp.arange(kw)[:, None, None]
    q_idx = jnp.arange(wp)[None, :, None]
    w_idx = jnp.arange(wout)[None, None, :]
    rw = (q_idx == stride * w_idx + j_idx).astype(jnp.float32)      # (kw, wp, wout)

    bcol = jnp.repeat(b.astype(jnp.float32), hout)[:, None]         # (cout*hout, 1)
    return lmat, rw, bcol, hout, wout


def _embed_matrices(cout, hout, wout, pad_next):
    """0/1 matrices mapping (cout*hout, wout) -> zero-padded (cout*hp', wp')."""
    hp_n, wp_n = hout + 2 * pad_next, wout + 2 * pad_next
    er = (jnp.arange(hp_n)[:, None] == jnp.arange(hout)[None, :] + pad_next)
    pr = jnp.kron(jnp.eye(cout, dtype=jnp.float32), er.astype(jnp.float32))
    pc = (jnp.arange(wp_n)[None, :] == jnp.arange(wout)[:, None] + pad_next)
    return pr, pc.astype(jnp.float32)


# ---------------------------------------------------------------------------
# ConvBlock forward (NCHW in, NCHW out), single fused pallas_call.
# ---------------------------------------------------------------------------
def conv_block_forward(cfg, params, x_nchw):
    nl = cfg['num_layers']
    n, cin, h, w = x_nchw.shape
    dtype = x_nchw.dtype

    # Pad + flatten the raw input once: (N, Cin, Hp, Wp) -> (N, Cin*Hp, Wp).
    p0 = cfg['padding'][0]
    xp = jnp.pad(x_nchw, ((0, 0), (0, 0), (p0, p0), (p0, p0)))
    hp0, wp0 = h + 2 * p0, w + 2 * p0
    x2 = xp.reshape(n, cin * hp0, wp0).astype(jnp.float32)

    mats = []
    flops = 0
    hin, win, c_in = h, w, cin
    for l in range(nl):
        wgt, bias = params[l]
        s, p, k = cfg['stride'][l], cfg['padding'][l], cfg['kernel'][l]
        c_out = cfg['out'][l]
        lmat, rw, bcol, hout, wout = _layer_matrices(wgt, bias, s, p, hin, win)
        mats += [lmat, rw, bcol]
        flops += 2 * n * c_out * hout * wout * c_in * k * k
        if l < nl - 1:
            pr, pc = _embed_matrices(c_out, hout, wout, cfg['padding'][l + 1])
            mats += [pr, pc]
        hin, win, c_in = hout, wout, c_out

    cout_last = cfg['out'][nl - 1]
    out_struct = jax.ShapeDtypeStruct((n, cout_last * hin, win), dtype)

    in_specs = [pl.BlockSpec((1, cin * hp0, wp0), lambda i: (i, 0, 0))]
    for m in mats:
        if m.ndim == 3:
            in_specs.append(pl.BlockSpec(m.shape, lambda i: (0, 0, 0)))
        else:
            in_specs.append(pl.BlockSpec(m.shape, lambda i: (0, 0)))
    out_specs = pl.BlockSpec((1, cout_last * hin, win), lambda i: (i, 0, 0))

    itemsize = jnp.dtype(jnp.float32).itemsize
    bytes_accessed = sum(int(a.size) * itemsize for a in [x2, *mats])
    bytes_accessed += n * cout_last * hin * win * jnp.dtype(dtype).itemsize

    out = pl.pallas_call(
        _make_fused_kernel(nl),
        out_shape=out_struct,
        grid=(n,),                                  # 2 steps -> both v7x TCs
        in_specs=in_specs,
        out_specs=out_specs,
        compiler_params=pltpu.CompilerParams(
            dimension_semantics=("parallel",),
            vmem_limit_bytes=32 * 1024 * 1024),
        cost_estimate=pl.CostEstimate(
            flops=flops, transcendentals=0, bytes_accessed=int(bytes_accessed)),
    )(x2, *mats)

    return out.reshape(n, cout_last, hin, win)      # NCHW, no transposes needed


# ---------------------------------------------------------------------------
# Params init + pure-JAX reference (lax conv) for correctness checking.
# ---------------------------------------------------------------------------
def init_conv_block_params(cfg, key):
    params = []
    for l in range(cfg['num_layers']):
        key, kw_key, kb_key = jax.random.split(key, 3)
        cin, cout, ksz = cfg['inp'][l], cfg['out'][l], cfg['kernel'][l]
        fan_in = cin * ksz * ksz
        scale = 1.0 / jnp.sqrt(jnp.float32(fan_in))
        w = jax.random.uniform(kw_key, (cout, cin, ksz, ksz),
                               jnp.float32, -scale, scale)
        b = jax.random.uniform(kb_key, (cout,), jnp.float32, -scale, scale)
        params.append((w, b))
    return params


def conv_block_reference(cfg, params, x_nchw):
    x = x_nchw
    for l in range(cfg['num_layers']):
        w, b = params[l]
        p, s = cfg['padding'][l], cfg['stride'][l]
        x = jax.lax.conv_general_dilated(
            x, w, window_strides=(s, s), padding=[(p, p), (p, p)],
            dimension_numbers=('NCHW', 'OIHW', 'NCHW'))
        x = jnp.maximum(x + b.reshape(1, -1, 1, 1), 0.0)
    return x


if __name__ == "__main__":
    cfg = {
        'num_layers': 2,
        'inp':     [4, 8],
        'out':     [8, 8],
        'kernel':  [3, 3],
        'stride':  [1, 2],
        'padding': [1, 1],
    }

    key = jax.random.PRNGKey(0)
    key, xkey, pkey = jax.random.split(key, 3)
    x = jax.random.normal(xkey, (2, 4, 16, 16), jnp.float32)   # NCHW
    params = init_conv_block_params(cfg, pkey)

    fwd = jax.jit(functools.partial(conv_block_forward, cfg))
    out = jax.block_until_ready(fwd(params, x))

    ref = conv_block_reference(cfg, params, x)
    assert out.shape == ref.shape, (out.shape, ref.shape)
    assert jnp.allclose(out, ref, atol=1e-4, rtol=1e-4), "mismatch vs reference"

    print("KERNEL_OK")
</pallas_src>

<mosaic_0001>
module attributes {stable_mosaic.version = 11 : i64} {
  func.func @kernel(%arg0: i32, %arg1: memref<1x72x18xf32, #tpu.memory_space<vmem>>, %arg2: memref<3x128x72xf32, #tpu.memory_space<vmem>>, %arg3: memref<3x18x16xf32, #tpu.memory_space<vmem>>, %arg4: memref<128x1xf32, #tpu.memory_space<vmem>>, %arg5: memref<144x128xf32, #tpu.memory_space<vmem>>, %arg6: memref<16x18xf32, #tpu.memory_space<vmem>>, %arg7: memref<3x64x144xf32, #tpu.memory_space<vmem>>, %arg8: memref<3x18x8xf32, #tpu.memory_space<vmem>>, %arg9: memref<64x1xf32, #tpu.memory_space<vmem>>, %arg10: memref<1x64x8xf32, #tpu.memory_space<vmem>>) attributes {dimension_semantics = [#tpu.dimension_semantics<parallel>], iteration_bounds = array<i64: 2>, scalar_prefetch = 0 : i64, scratch_operands = 0 : i64, tpu.core_type = #tpu.core_type<tc>, window_params = [{transform_indices = @transform_0, window_bounds = array<i64: 1, 72, 18>}, {pipeline_mode = #tpu.pipeline_mode<synchronous>, transform_indices = @transform_1, window_bounds = array<i64: 3, 128, 72>}, {pipeline_mode = #tpu.pipeline_mode<synchronous>, transform_indices = @transform_2, window_bounds = array<i64: 3, 18, 16>}, {pipeline_mode = #tpu.pipeline_mode<synchronous>, transform_indices = @transform_3, window_bounds = array<i64: 128, 1>}, {pipeline_mode = #tpu.pipeline_mode<synchronous>, transform_indices = @transform_4, window_bounds = array<i64: 144, 128>}, {pipeline_mode = #tpu.pipeline_mode<synchronous>, transform_indices = @transform_5, window_bounds = array<i64: 16, 18>}, {pipeline_mode = #tpu.pipeline_mode<synchronous>, transform_indices = @transform_6, window_bounds = array<i64: 3, 64, 144>}, {pipeline_mode = #tpu.pipeline_mode<synchronous>, transform_indices = @transform_7, window_bounds = array<i64: 3, 18, 8>}, {pipeline_mode = #tpu.pipeline_mode<synchronous>, transform_indices = @transform_8, window_bounds = array<i64: 64, 1>}, {transform_indices = @transform_9, window_bounds = array<i64: 1, 64, 8>}]} {
    %c0 = arith.constant 0 : index
    %c0_0 = arith.constant 0 : index
    %c0_1 = arith.constant 0 : index
    %0 = vector.load %arg1[%c0, %c0_0, %c0_1] : memref<1x72x18xf32, #tpu.memory_space<vmem>>, vector<1x72x18xf32>
    %1 = vector.shape_cast %0 : vector<1x72x18xf32> to vector<72x18xf32>
    %c0_2 = arith.constant 0 : index
    %c0_3 = arith.constant 0 : index
    %c0_4 = arith.constant 0 : index
    %2 = vector.load %arg3[%c0_2, %c0_3, %c0_4] : memref<3x18x16xf32, #tpu.memory_space<vmem>>, vector<1x18x16xf32>
    %3 = vector.shape_cast %2 : vector<1x18x16xf32> to vector<18x16xf32>
    %cst = arith.constant dense<0.000000e+00> : vector<72x16xf32>
    %4 = tpu.matmul %1, %3, %cst {dimension_numbers = #tpu.dot_dimension_numbers<[1], [0], [0], [1], [0, 0, 1, 1], [], []>} : vector<72x18xf32>, vector<18x16xf32>, vector<72x16xf32> -> vector<72x16xf32>
    %c0_5 = arith.constant 0 : index
    %c0_6 = arith.constant 0 : index
    %c0_7 = arith.constant 0 : index
    %5 = vector.load %arg2[%c0_5, %c0_6, %c0_7] : memref<3x128x72xf32, #tpu.memory_space<vmem>>, vector<1x128x72xf32>
    %6 = vector.shape_cast %5 : vector<1x128x72xf32> to vector<128x72xf32>
    %cst_8 = arith.constant dense<0.000000e+00> : vector<128x16xf32>
    %7 = tpu.matmul %6, %4, %cst_8 {dimension_numbers = #tpu.dot_dimension_numbers<[1], [0], [0], [1], [0, 0, 1, 1], [], []>} : vector<128x72xf32>, vector<72x16xf32>, vector<128x16xf32> -> vector<128x16xf32>
    %c1 = arith.constant 1 : index
    %c0_9 = arith.constant 0 : index
    %c0_10 = arith.constant 0 : index
    %8 = vector.load %arg3[%c1, %c0_9, %c0_10] : memref<3x18x16xf32, #tpu.memory_space<vmem>>, vector<1x18x16xf32>
    %9 = vector.shape_cast %8 : vector<1x18x16xf32> to vector<18x16xf32>
    %cst_11 = arith.constant dense<0.000000e+00> : vector<72x16xf32>
    %10 = tpu.matmul %1, %9, %cst_11 {dimension_numbers = #tpu.dot_dimension_numbers<[1], [0], [0], [1], [0, 0, 1, 1], [], []>} : vector<72x18xf32>, vector<18x16xf32>, vector<72x16xf32> -> vector<72x16xf32>
    %c1_12 = arith.constant 1 : index
    %c0_13 = arith.constant 0 : index
    %c0_14 = arith.constant 0 : index
    %11 = vector.load %arg2[%c1_12, %c0_13, %c0_14] : memref<3x128x72xf32, #tpu.memory_space<vmem>>, vector<1x128x72xf32>
    %12 = vector.shape_cast %11 : vector<1x128x72xf32> to vector<128x72xf32>
    %cst_15 = arith.constant dense<0.000000e+00> : vector<128x16xf32>
    %13 = tpu.matmul %12, %10, %cst_15 {dimension_numbers = #tpu.dot_dimension_numbers<[1], [0], [0], [1], [0, 0, 1, 1], [], []>} : vector<128x72xf32>, vector<72x16xf32>, vector<128x16xf32> -> vector<128x16xf32>
    %14 = arith.addf %7, %13 : vector<128x16xf32>
    %c2 = arith.constant 2 : index
    %c0_16 = arith.constant 0 : index
    %c0_17 = arith.constant 0 : index
    %15 = vector.load %arg3[%c2, %c0_16, %c0_17] : memref<3x18x16xf32, #tpu.memory_space<vmem>>, vector<1x18x16xf32>
    %16 = vector.shape_cast %15 : vector<1x18x16xf32> to vector<18x16xf32>
    %cst_18 = arith.constant dense<0.000000e+00> : vector<72x16xf32>
    %17 = tpu.matmul %1, %16, %cst_18 {dimension_numbers = #tpu.dot_dimension_numbers<[1], [0], [0], [1], [0, 0, 1, 1], [], []>} : vector<72x18xf32>, vector<18x16xf32>, vector<72x16xf32> -> vector<72x16xf32>
    %c2_19 = arith.constant 2 : index
    %c0_20 = arith.constant 0 : index
    %c0_21 = arith.constant 0 : index
    %18 = vector.load %arg2[%c2_19, %c0_20, %c0_21] : memref<3x128x72xf32, #tpu.memory_space<vmem>>, vector<1x128x72xf32>
    %19 = vector.shape_cast %18 : vector<1x128x72xf32> to vector<128x72xf32>
    %cst_22 = arith.constant dense<0.000000e+00> : vector<128x16xf32>
    %20 = tpu.matmul %19, %17, %cst_22 {dimension_numbers = #tpu.dot_dimension_numbers<[1], [0], [0], [1], [0, 0, 1, 1], [], []>} : vector<128x72xf32>, vector<72x16xf32>, vector<128x16xf32> -> vector<128x16xf32>
    %21 = arith.addf %14, %20 : vector<128x16xf32>
    %c0_23 = arith.constant 0 : index
    %c0_24 = arith.constant 0 : index
    %22 = vector.load %arg4[%c0_23, %c0_24] : memref<128x1xf32, #tpu.memory_space<vmem>>, vector<128x1xf32>
    %23 = vector.broadcast %22 : vector<128x1xf32> to vector<128x16xf32>
    %24 = arith.addf %21, %23 : vector<128x16xf32>
    %cst_25 = arith.constant 0.000000e+00 : f32
    %25 = vector.broadcast %cst_25 : f32 to vector<128x16xf32>
    %26 = arith.maximumf %24, %25 : vector<128x16xf32>
    %c0_26 = arith.constant 0 : index
    %c0_27 = arith.constant 0 : index
    %27 = vector.load %arg5[%c0_26, %c0_27] : memref<144x128xf32, #tpu.memory_space<vmem>>, vector<144x128xf32>
    %c0_28 = arith.constant 0 : index
    %c0_29 = arith.constant 0 : index
    %28 = vector.load %arg6[%c0_28, %c0_29] : memref<16x18xf32, #tpu.memory_space<vmem>>, vector<16x18xf32>
    %cst_30 = arith.constant dense<0.000000e+00> : vector<128x18xf32>
    %29 = tpu.matmul %26, %28, %cst_30 {dimension_numbers = #tpu.dot_dimension_numbers<[1], [0], [0], [1], [0, 0, 1, 1], [], []>} : vector<128x16xf32>, vector<16x18xf32>, vector<128x18xf32> -> vector<128x18xf32>
    %cst_31 = arith.constant dense<0.000000e+00> : vector<144x18xf32>
    %30 = tpu.matmul %27, %29, %cst_31 {dimension_numbers = #tpu.dot_dimension_numbers<[1], [0], [0], [1], [0, 0, 1, 1], [], []>} : vector<144x128xf32>, vector<128x18xf32>, vector<144x18xf32> -> vector<144x18xf32>
    %c0_32 = arith.constant 0 : index
    %c0_33 = arith.constant 0 : index
    %c0_34 = arith.constant 0 : index
    %31 = vector.load %arg8[%c0_32, %c0_33, %c0_34] : memref<3x18x8xf32, #tpu.memory_space<vmem>>, vector<1x18x8xf32>
    %32 = vector.shape_cast %31 : vector<1x18x8xf32> to vector<18x8xf32>
    %cst_35 = arith.constant dense<0.000000e+00> : vector<144x8xf32>
    %33 = tpu.matmul %30, %32, %cst_35 {dimension_numbers = #tpu.dot_dimension_numbers<[1], [0], [0], [1], [0, 0, 1, 1], [], []>} : vector<144x18xf32>, vector<18x8xf32>, vector<144x8xf32> -> vector<144x8xf32>
    %c0_36 = arith.constant 0 : index
    %c0_37 = arith.constant 0 : index
    %c0_38 = arith.constant 0 : index
    %34 = vector.load %arg7[%c0_36, %c0_37, %c0_38] : memref<3x64x144xf32, #tpu.memory_space<vmem>>, vector<1x64x144xf32>
    %35 = vector.shape_cast %34 : vector<1x64x144xf32> to vector<64x144xf32>
    %cst_39 = arith.constant dense<0.000000e+00> : vector<64x8xf32>
    %36 = tpu.matmul %35, %33, %cst_39 {dimension_numbers = #tpu.dot_dimension_numbers<[1], [0], [0], [1], [0, 0, 1, 1], [], []>} : vector<64x144xf32>, vector<144x8xf32>, vector<64x8xf32> -> vector<64x8xf32>
    %c1_40 = arith.constant 1 : index
    %c0_41 = arith.constant 0 : index
    %c0_42 = arith.constant 0 : index
    %37 = vector.load %arg8[%c1_40, %c0_41, %c0_42] : memref<3x18x8xf32, #tpu.memory_space<vmem>>, vector<1x18x8xf32>
    %38 = vector.shape_cast %37 : vector<1x18x8xf32> to vector<18x8xf32>
    %cst_43 = arith.constant dense<0.000000e+00> : vector<144x8xf32>
    %39 = tpu.matmul %30, %38, %cst_43 {dimension_numbers = #tpu.dot_dimension_numbers<[1], [0], [0], [1], [0, 0, 1, 1], [], []>} : vector<144x18xf32>, vector<18x8xf32>, vector<144x8xf32> -> vector<144x8xf32>
    %c1_44 = arith.constant 1 : index
    %c0_45 = arith.constant 0 : index
    %c0_46 = arith.constant 0 : index
    %40 = vector.load %arg7[%c1_44, %c0_45, %c0_46] : memref<3x64x144xf32, #tpu.memory_space<vmem>>, vector<1x64x144xf32>
    %41 = vector.shape_cast %40 : vector<1x64x144xf32> to vector<64x144xf32>
    %cst_47 = arith.constant dense<0.000000e+00> : vector<64x8xf32>
    %42 = tpu.matmul %41, %39, %cst_47 {dimension_numbers = #tpu.dot_dimension_numbers<[1], [0], [0], [1], [0, 0, 1, 1], [], []>} : vector<64x144xf32>, vector<144x8xf32>, vector<64x8xf32> -> vector<64x8xf32>
    %43 = arith.addf %36, %42 : vector<64x8xf32>
    %c2_48 = arith.constant 2 : index
    %c0_49 = arith.constant 0 : index
    %c0_50 = arith.constant 0 : index
    %44 = vector.load %arg8[%c2_48, %c0_49, %c0_50] : memref<3x18x8xf32, #tpu.memory_space<vmem>>, vector<1x18x8xf32>
    %45 = vector.shape_cast %44 : vector<1x18x8xf32> to vector<18x8xf32>
    %cst_51 = arith.constant dense<0.000000e+00> : vector<144x8xf32>
    %46 = tpu.matmul %30, %45, %cst_51 {dimension_numbers = #tpu.dot_dimension_numbers<[1], [0], [0], [1], [0, 0, 1, 1], [], []>} : vector<144x18xf32>, vector<18x8xf32>, vector<144x8xf32> -> vector<144x8xf32>
    %c2_52 = arith.constant 2 : index
    %c0_53 = arith.constant 0 : index
    %c0_54 = arith.constant 0 : index
    %47 = vector.load %arg7[%c2_52, %c0_53, %c0_54] : memref<3x64x144xf32, #tpu.memory_space<vmem>>, vector<1x64x144xf32>
    %48 = vector.shape_cast %47 : vector<1x64x144xf32> to vector<64x144xf32>
    %cst_55 = arith.constant dense<0.000000e+00> : vector<64x8xf32>
    %49 = tpu.matmul %48, %46, %cst_55 {dimension_numbers = #tpu.dot_dimension_numbers<[1], [0], [0], [1], [0, 0, 1, 1], [], []>} : vector<64x144xf32>, vector<144x8xf32>, vector<64x8xf32> -> vector<64x8xf32>
    %50 = arith.addf %43, %49 : vector<64x8xf32>
    %c0_56 = arith.constant 0 : index
    %c0_57 = arith.constant 0 : index
    %51 = vector.load %arg9[%c0_56, %c0_57] : memref<64x1xf32, #tpu.memory_space<vmem>>, vector<64x1xf32>
    %52 = vector.broadcast %51 : vector<64x1xf32> to vector<64x8xf32>
    %53 = arith.addf %50, %52 : vector<64x8xf32>
    %cst_58 = arith.constant 0.000000e+00 : f32
    %54 = vector.broadcast %cst_58 : f32 to vector<64x8xf32>
    %55 = arith.maximumf %53, %54 : vector<64x8xf32>
    %c0_59 = arith.constant 0 : index
    %c0_60 = arith.constant 0 : index
    %c0_61 = arith.constant 0 : index
    %56 = vector.load %arg10[%c0_59, %c0_60, %c0_61] : memref<1x64x8xf32, #tpu.memory_space<vmem>>, vector<1x64x8xf32>
    %57 = vector.shape_cast %56 : vector<1x64x8xf32> to vector<64x8xf32>
    %58 = vector.shape_cast %55 : vector<64x8xf32> to vector<1x64x8xf32>
    tpu.vector_store %arg10[%c0_59, %c0_60, %c0_61], %58 {strides = array<i32>} : memref<1x64x8xf32, #tpu.memory_space<vmem>>, vector<1x64x8xf32>,
    return
  }
  func.func @transform_0(%arg0: i32) -> (i32, i32, i32) {
    %c0_i32 = arith.constant 0 : i32
    %c0_i32_0 = arith.constant 0 : i32
    %c0_i32_1 = arith.constant 0 : i32
    return %arg0, %c0_i32, %c0_i32_0 : i32, i32, i32
  }
  func.func @transform_1(%arg0: i32) -> (i32, i32, i32) {
    %c0_i32 = arith.constant 0 : i32
    %c0_i32_0 = arith.constant 0 : i32
    %c0_i32_1 = arith.constant 0 : i32
    %c0_i32_2 = arith.constant 0 : i32
    return %c0_i32, %c0_i32_0, %c0_i32_1 : i32, i32, i32
  }
  func.func @transform_2(%arg0: i32) -> (i32, i32, i32) {
    %c0_i32 = arith.constant 0 : i32
    %c0_i32_0 = arith.constant 0 : i32
    %c0_i32_1 = arith.constant 0 : i32
    %c0_i32_2 = arith.constant 0 : i32
    return %c0_i32, %c0_i32_0, %c0_i32_1 : i32, i32, i32
  }
  func.func @transform_3(%arg0: i32) -> (i32, i32) {
    %c0_i32 = arith.constant 0 : i32
    %c0_i32_0 = arith.constant 0 : i32
    %c0_i32_1 = arith.constant 0 : i32
    return %c0_i32, %c0_i32_0 : i32, i32
  }
  func.func @transform_4(%arg0: i32) -> (i32, i32) {
    %c0_i32 = arith.constant 0 : i32
    %c0_i32_0 = arith.constant 0 : i32
    %c0_i32_1 = arith.constant 0 : i32
    return %c0_i32, %c0_i32_0 : i32, i32
  }
  func.func @transform_5(%arg0: i32) -> (i32, i32) {
    %c0_i32 = arith.constant 0 : i32
    %c0_i32_0 = arith.constant 0 : i32
    %c0_i32_1 = arith.constant 0 : i32
    return %c0_i32, %c0_i32_0 : i32, i32
  }
  func.func @transform_6(%arg0: i32) -> (i32, i32, i32) {
    %c0_i32 = arith.constant 0 : i32
    %c0_i32_0 = arith.constant 0 : i32
    %c0_i32_1 = arith.constant 0 : i32
    %c0_i32_2 = arith.constant 0 : i32
    return %c0_i32, %c0_i32_0, %c0_i32_1 : i32, i32, i32
  }
  func.func @transform_7(%arg0: i32) -> (i32, i32, i32) {
    %c0_i32 = arith.constant 0 : i32
    %c0_i32_0 = arith.constant 0 : i32
    %c0_i32_1 = arith.constant 0 : i32
    %c0_i32_2 = arith.constant 0 : i32
    return %c0_i32, %c0_i32_0, %c0_i32_1 : i32, i32, i32
  }
  func.func @transform_8(%arg0: i32) -> (i32, i32) {
    %c0_i32 = arith.constant 0 : i32
    %c0_i32_0 = arith.constant 0 : i32
    %c0_i32_1 = arith.constant 0 : i32
    return %c0_i32, %c0_i32_0 : i32, i32
  }
  func.func @transform_9(%arg0: i32) -> (i32, i32, i32) {
    %c0_i32 = arith.constant 0 : i32
    %c0_i32_0 = arith.constant 0 : i32
    %c0_i32_1 = arith.constant 0 : i32
    return %arg0, %c0_i32, %c0_i32_0 : i32, i32, i32
  }
}

</mosaic_0001>

<bundles_post_ra>
// kernel: conv_block_forward.1
= control target key start
LH: loop header
LB: loop body
LE: loop exit
PB: predicated region body
PF: predicated region fallthrough
CT: control target
= control target key end

     0   :  { %14 = vsyncpa [#allocation3], 0  ;;  %s5315_s0 = inlined_call_operand.vmem [shape: f32[2,72,18], index: 0, kind: input, shape index: {}]   ;;  %s5316_s1 = inlined_call_operand.vmem [shape: f32[3,128,72], index: 1, kind: input, shape index: {}]   ;;  %s5317_s2 = inlined_call_operand.vmem [shape: f32[3,18,16], index: 2, kind: input, shape index: {}]   ;;  %s5318_s3 = inlined_call_operand.vmem [shape: f32[128,1], index: 3, kind: input, shape index: {}]   ;;  %s5319_s4 = inlined_call_operand.vmem [shape: f32[144,128], index: 4, kind: input, shape index: {}]   ;;  %s5320_s5 = inlined_call_operand.vmem [shape: f32[16,18], index: 5, kind: input, shape index: {}]   ;;  %s5321_s6 = inlined_call_operand.vmem [shape: f32[3,64,144], index: 6, kind: input, shape index: {}]   ;;  %s5322_s7 = inlined_call_operand.vmem [shape: f32[3,18,8], index: 7, kind: input, shape index: {}]   ;;  %s5323_s8 = inlined_call_operand.vmem [shape: f32[64,1], index: 8, kind: input, shape index: {}]   ;;  %s5324_s9 = inlined_call_operand.hbm [shape: f32[2,64,8], index: 9, kind: output, shape index: {}]  }
   0x1   :  { %16 = vsyncpa [#allocation3 + $0x1], 0  ;;  %s4300_s30 = smov 0   ;;  %s4302_s10 = smov 0  }
   0x2   :  { %s4304_s11 = smov 0   ;;  %s4306_s12 = smov 0  }
   0x3 LB: > { %s4321_s13 = sadd.s32 4294967295, %s4241_s12   ;;  %s2995_s14 = sadd.s32 4294967294, %s4241_s12   ;;  %s4241_s12 = sphi %s4306_s12, %s5330_s12   ;;  %s4237_s11 = sphi %s4304_s11, %s5329_s11   ;;  %s4233_s10 = sphi %s4302_s10, %s5328_s10   ;;  %s4229_s30 = sphi %s4300_s30, %s5327_s30  }
   0x4   : > { %s4325_s15 = sadd.s32 1, %s4241_s12   ;;  %s223_s16 = sadd.s32 1, %s4237_s11 }
   0x5   : > { %s220_s17 = ssub.s32 %s4241_s12, %s4325_s15  ;;  %p233_p0 = scmp.ne.s32.totalorder %s4237_s11, %s4233_s10 }
   0x6   : > { %p221_p1 = scmp.eq.s32.totalorder %s220_s17, 0  ;;  %p234_p2 = scmp.eq.s32.totalorder %s4321_s13, 1 }
   0x7   : > { %p239_p3 = scmp.ne.s32.totalorder %s4233_s10, %s4229_s30  ;;  %p240_p4 = scmp.eq.s32.totalorder %s2995_s14, 1 }
   0x8   : > { %s4336_s18 = scalar_select %p221_p1, %s4237_s11, %s223_s16  }
   0x9   : > { %p4338_p5 = por %p234_p2, %p233_p0  ;;  %p4342_p6 = por %p240_p4, %p239_p3 }
   0xa   : > { %p2998_p7 = scmp.ge.s32.totalorder %s4241_s12, 1  ;;  %p290_p8 = scmp.lt.s32.totalorder %s4241_s12, 3 }
   0xc   : > { %p291_p9 = pnand %p2998_p7, %p290_p8 }
   0xd   : > { %v3011_v0 = vld [vmem:[%s5317_s2 + $0x18] sm:$0xff] (!%p291_p9)  ;;  %v3012_v1 = vld [vmem:[%s5317_s2 + $0x20] sm:$0xff] (!%p291_p9)  ;;  %v4243_v2 = vmov (!%p291_p9), 0.0|0.0   ;;  %vm4244_vm0 = vmmov (!%p291_p9), 0   ;;  %v4245_v4 = vmov (!%p291_p9), 0.0   ;;  %p326_p10 = scmp.lt.s32.totalorder (!%p291_p9), %s4321_s13, 1 }
   0xe   : > { %294 = sbr.rel (%p291_p9) target bundleno = 1807 (0x70f), region = 56  ;;  %3898 = vmatprep.subr.bf16.mxu1 (!%p291_p9), %v4243_v2  ;;  %v3899_v3 = vpack.c.bf16 (!%p291_p9), %v3012_v1, %v3011_v0  ;;  %3523 = vmatprep.mubr.msk.f32.mxu1 (!%p291_p9), %vm4244_vm0, %v4245_v4  ;;  %v340_v5 = vld [vmem:[%s5317_s2] sm:$0xff] (!%p291_p9)  ;;  %v341_v6 = vld [vmem:[%s5317_s2 + $0x8] sm:$0xff] (!%p291_p9)  ;;  %vm371_vm1 = vcmask (!%p291_p9), 1041408   ;;  %v3072_v9 = vld [vmem:[%s5317_s2 + $0x30] sm:$0xff] (!%p291_p9)  ;;  %vm343_vm2 = vcmask (!%p291_p9), 146432  }
   0xf   : > { %3895 = vmatprep.subr.bf16.mxu0 (!%p291_p9), %v4243_v2  ;;  %v3896_v7 = vpack.c.bf16 (!%p291_p9), %v341_v6, %v340_v5  ;;  %3490 = vmatprep.mubr.msk.f32.mxu0 (!%p291_p9), %vm4244_vm0, %v4245_v4  ;;  %v3013_v8 = vld [vmem:[%s5317_s2 + $0x28] sm:$0x3] (!%p291_p9)  ;;  %v3073_v10 = vld [vmem:[%s5317_s2 + $0x38] sm:$0xff] (!%p291_p9)  ;;  %v342_v11 = vld [vmem:[%s5317_s2 + $0x10] sm:$0x3] (!%p291_p9)  ;;  %vm635_vm3 = vcmask (!%p291_p9), 588800  }
  0x10   : > { %3900 = vmatpush3.bf16.msra.mxu1 (!%p291_p9), %v3899_v3  ;;  %v3934_v12 = vpack.c.bf16 (!%p291_p9), %v3073_v10, %v3072_v9  ;;  %v3074_v15 = vld [vmem:[%s5317_s2 + $0x40] sm:$0x3] (!%p291_p9)  ;;  %v1367_v29 = vld [vmem:[%s5318_s3 + $0x10] sm:$0xff] (!%p291_p9)  ;;  %v4246_v30 = vmov (!%p291_p9), 0   ;;  %v1366_v33 = vld [vmem:[%s5318_s3 + $0x8] sm:$0xff] (!%p291_p9)  ;;  %vm1513_vm4 = vcmask (!%p291_p9), 130048  }
  0x11   : > { %3521 = vmatprep.subr.mxu1 (!%p291_p9), %v4245_v4  ;;  %3897 = vmatpush3.bf16.msra.mxu0 (!%p291_p9), %v3896_v7  ;;  %v3024_v23 = vld [vmem:[%s5316_s1 + $0x80] sm:$0xff] (!%p291_p9)  ;;  %v1368_v38 = vld [vmem:[%s5318_s3 + $0x18] sm:$0xff] (!%p291_p9)  ;;  %v1370_v44 = vld [vmem:[%s5318_s3 + $0x28] sm:$0xff] (!%p291_p9)  ;;  %vm2910_vm5 = vcmask (!%p291_p9), 64512   ;;  %s3257_s21 = sshll.u32 (!%p291_p9), %s4321_s13, 10  ;;  %s4247_s27 = smov (!%p291_p9), [#allocation2]  }
  0x12   : > { %3488 = vmatprep.subr.mxu0 (!%p291_p9), %v4245_v4  ;;  %v1365_v28 = vld [vmem:[%s5318_s3] sm:$0xff] (!%p291_p9)  ;;  %4177 = vset.pattern.permute.xlu0 (!%p291_p9), %v4246_v30  ;;  %v1371_v47 = vld [vmem:[%s5318_s3 + $0x30] sm:$0xff] (!%p291_p9)  ;;  %v1372_v52 = vld [vmem:[%s5318_s3 + $0x38] sm:$0xff] (!%p291_p9)  ;;  %s5266_s25 = scalar_lea.hbm (!%p291_p9), %s5324_s9, %s3257_s21  ;;  %s4183_s28 = sshll.u32 (!%p291_p9), %s4247_s27, 4  ;;  %s4184_s28 = int_to_ptr.vmem [resolvable:$false] %s4183_s28 }
  0x13   : > { %4178 = vset.pattern.permute.xlu1 (!%p291_p9), %v4246_v30  ;;  %1383 = vperm.xlu0 (!%p291_p9), %4177, %v1365_v28   ;;  %v1369_v41 = vld [vmem:[%s5318_s3 + $0x20] sm:$0xff] (!%p291_p9)  ;;  %v1374_v58 = vld [vmem:[%s5318_s3 + $0x48] sm:$0xff] (!%p291_p9)  ;;  %v1375_v0 = vld [vmem:[%s5318_s3 + $0x50] sm:$0xff] (!%p291_p9) }
  0x14   : > { %3522 = vmatpush3.msk.msra.mxu1 (!%p291_p9), %vm371_vm1, %v3013_v8  ;;  %1393 = vperm.xlu1 (!%p291_p9), %4178, %v1367_v29   ;;  %v1373_v55 = vld [vmem:[%s5318_s3 + $0x40] sm:$0xff] (!%p291_p9)  ;;  %v1512_v60 = vld [vmem:[%s5320_s5 + $0x8] sm:$0xff] (!%p291_p9)  ;;  %v1376_v6 = vld [vmem:[%s5318_s3 + $0x58] sm:$0xff] (!%p291_p9) }
  0x15   : > { %s327_s29 = scalar_select %p326_p10, %s4321_s13, 1  ;;  %3489 = vmatpush3.msk.msra.mxu0 %vm371_vm1, %v342_v11  ;;  %3933 = vmatprep.subr.bf16.mxu1 %v4243_v2  ;;  %v1511_v59 = vld [vmem:[%s5320_s5] sm:$0xff]  ;;  %v3026_v28 = vld [vmem:[%s5316_s1 + $0x90] sm:$0xff] }
  0x16   : > { %v3952_v61 = vpack.c.bf16 %v1512_v60, %v1511_v59  ;;  %v1377_v9 = vld [vmem:[%s5318_s3 + $0x60] sm:$0xff]  ;;  %v2848_v30 = vld [vmem:[%s5323_s8 + $0x10] sm:$0xff]  ;;  %v3037_v60 = vld [vmem:[%s5316_s1 + $0xe8] sm:$0xff] }
  0x17   : > { %s4131_s24 = smul.u32 72, %s327_s29  ;;  %1388 = vperm.xlu0 %4177, %v1366_v33   ;;  %v3027_v33 = vld [vmem:[%s5316_s1 + $0x98] sm:$0xff]  ;;  %s323_s29 = sand.u32 1, %s4233_s10  }
  0x18   : > { %1398 = vperm.xlu1 %4178, %v1368_v38   ;;  %s2999_s16 = sshll.u32 %s323_s29, 6  ;;  %s5274_s13 = scalar_lea.sflag [#allocation3], %s323_s29 }
  0x19   : > { %s4386_s14 = scalar_lea.vmem %s5315_s0, %s4131_s24  ;;  %s5240_s17 = scalar_lea.vmem [#allocation2], %s2999_s16 }
  0x1a   : > { %v331_v13 = vld [vmem:[%s4386_s14] sm:$0xff]  ;;  %v332_v14 = vld [vmem:[%s4386_s14 + $0x8] sm:$0xff]  ;;  %v333_v16 = vld [vmem:[%s4386_s14 + $0x10] sm:$0xff]  ;;  %s2933_s22 = sshll.u32 %s5240_s17, 4  ;;  %s5268_s22 = int_to_ptr.vmem [resolvable:$true] %s2933_s22 }
  0x1b   : > { %3524 = vmatmul.mubr.msk.f32.vlgmr.msra.gmra.mrb[0].mxu1 %vm343_vm2, %v331_v13  ;;  %3491 = vmatmul.mubr.msk.f32.vlgmr.msra.gmra.mrb[0].mxu0 %vm343_vm2, %v331_v13  ;;  %v334_v17 = vld [vmem:[%s4386_s14 + $0x18] sm:$0xff]  ;;  %v335_v18 = vld [vmem:[%s4386_s14 + $0x20] sm:$0xff]  ;;  %v336_v19 = vld [vmem:[%s4386_s14 + $0x28] sm:$0xff]  ;;  %s4179_s26 = scalar_lea.vmem %s5268_s22, 1024  ;;  %p4186_p0 = scmp.lt.s32.totalorder %s5268_s22, %s4184_s28 }
  0x1c   : > { %3526 = vmatprep.mubr.msk.f32.mxu1 %vm4244_vm0, %v4245_v4  ;;  %3493 = vmatprep.mubr.msk.f32.mxu0 %vm4244_vm0, %v4245_v4  ;;  %v337_v20 = vld [vmem:[%s4386_s14 + $0x30] sm:$0xff]  ;;  %v338_v21 = vld [vmem:[%s4386_s14 + $0x38] sm:$0xff]  ;;  %v339_v22 = vld [vmem:[%s4386_s14 + $0x40] sm:$0xff]  ;;  %p4180_p11 = scmp.ne.s32.totalorder %s5268_s22, %s4179_s26  ;;  %s4185_s14 = scalar_lea.vmem %s4184_s28, 2048 }
  0x1d   : > { %3935 = vmatpush3.bf16.msra.mxu1 %v3934_v12  ;;  %1403 = vperm.xlu0 %4177, %v1369_v41   ;;  %v1378_v12 = vld [vmem:[%s5318_s3 + $0x68] sm:$0xff]  ;;  %v3030_v41 = vld [vmem:[%s5316_s1 + $0xb0] sm:$0xff]  ;;  %p4187_p1 = scmp.lt.s32.totalorder %s4185_s14, %s4179_s26 }
  0x1e   : > { %3638 = vmatprep.subr.mxu1 %v4245_v4  ;;  %1408 = vperm.xlu1 %4178, %v1370_v44   ;;  %p4181_p12 = pnand %p4180_p11, %p4338_p5 }
  0x1f   : > { %3527 = vmatmul.mubr.msk.f32.gmra.mrb[2].mxu1 %vm343_vm2, %v332_v14  ;;  %3494 = vmatmul.mubr.msk.f32.gmra.mrb[2].mxu0 %vm343_vm2, %v332_v14  ;;  %p4188_p2 = por %p4187_p1, %p4186_p0 }
  0x20   : > { %3529 = vmatprep.mubr.msk.f32.mxu1 %vm4244_vm0, %v4245_v4  ;;  %3496 = vmatprep.mubr.msk.f32.mxu0 %vm4244_vm0, %v4245_v4  ;;  %p4182_p13 = pneg %p4181_p12 }
  0x21   : > { %3639 = vmatpush3.msk.msra.mxu1 %vm371_vm1, %v3074_v15  ;;  %1413 = vperm.xlu0 %4177, %v1371_v47   ;;  %v1379_v15 = vld [vmem:[%s5318_s3 + $0x70] sm:$0xff]  ;;  %v3032_v47 = vld [vmem:[%s5316_s1 + $0xc0] sm:$0xff] }
  0x22   : > { %1418 = vperm.xlu1 %4178, %v1372_v52   ;;  %3953 = vmatprep.subr.bf16.mxu1 %v3952_v61  ;;  %v3034_v52 = vld [vmem:[%s5316_s1 + $0xd0] sm:$0xff]  ;;  %p4189_p3 = pnand %p4188_p2, %p4182_p13 }
  0x23   : > { %3530 = vmatmul.mubr.msk.f32.gmra.mrb[4].mxu1 %vm343_vm2, %v333_v16  ;;  %3497 = vmatmul.mubr.msk.f32.gmra.mrb[4].mxu0 %vm343_vm2, %v333_v16 }
  0x24   : > { %3532 = vmatprep.mubr.msk.f32.mxu1 %vm4244_vm0, %v4245_v4  ;;  %3499 = vmatprep.mubr.msk.f32.mxu0 %vm4244_vm0, %v4245_v4 }
  0x25   : > { %1423 = vperm.xlu0 %4177, %v1373_v55   ;;  %v3035_v55 = vld [vmem:[%s5316_s1 + $0xd8] sm:$0xff] }
  0x26   : > { %1428 = vperm.xlu1 %4178, %v1374_v58  }
  0x27   : > { %3533 = vmatmul.mubr.msk.f32.gmra.mrb[6].mxu1 %vm343_vm2, %v334_v17  ;;  %3500 = vmatmul.mubr.msk.f32.gmra.mrb[6].mxu0 %vm343_vm2, %v334_v17 }
  0x28   : > { %3535 = vmatprep.mubr.msk.f32.mxu1 %vm4244_vm0, %v4245_v4  ;;  %3502 = vmatprep.mubr.msk.f32.mxu0 %vm4244_vm0, %v4245_v4 }
  0x29   : > { %1433 = vperm.xlu0 %4177, %v1375_v0   ;;  %v3039_v0 = vld [vmem:[%s5316_s1 + $0xf8] sm:$0xff] }
  0x2a   : > { %1438 = vperm.xlu1 %4178, %v1376_v6   ;;  %v486_v6 = vld [vmem:[%s5316_s1 + $0x8] sm:$0xff] }
  0x2b   : > { %3536 = vmatmul.mubr.msk.f32.gmra.mrb[8].mxu1 %vm343_vm2, %v335_v18  ;;  %3503 = vmatmul.mubr.msk.f32.gmra.mrb[8].mxu0 %vm343_vm2, %v335_v18 }
  0x2c   : > { %3538 = vmatprep.mubr.msk.f32.mxu1 %vm4244_vm0, %v4245_v4  ;;  %3505 = vmatprep.mubr.msk.f32.mxu0 %vm4244_vm0, %v4245_v4 }
  0x2d   : > { %1443 = vperm.xlu0 %4177, %v1377_v9  }
  0x2e   : > { %1448 = vperm.xlu1 %4178, %v1378_v12   ;;  %v490_v12 = vld [vmem:[%s5316_s1 + $0x28] sm:$0xff] }
  0x2f   : > { %3539 = vmatmul.mubr.msk.f32.gmra.mrb[10].mxu1 %vm343_vm2, %v336_v19  ;;  %3506 = vmatmul.mubr.msk.f32.gmra.mrb[10].mxu0 %vm343_vm2, %v336_v19 }
  0x30   : > { %3541 = vmatprep.mubr.msk.f32.mxu1 %vm4244_vm0, %v4245_v4  ;;  %3508 = vmatprep.mubr.msk.f32.mxu0 %vm4244_vm0, %v4245_v4 }
  0x31   : > { %1453 = vperm.xlu0 %4177, %v1379_v15   ;;  %v493_v15 = vld [vmem:[%s5316_s1 + $0x40] sm:$0xff] }
  0x33   : > { %3542 = vmatmul.mubr.msk.f32.gmra.mrb[12].mxu1 %vm343_vm2, %v337_v20  ;;  %3509 = vmatmul.mubr.msk.f32.gmra.mrb[12].mxu0 %vm343_vm2, %v337_v20 }
  0x34   : > { %3544 = vmatprep.mubr.msk.f32.mxu1 %vm4244_vm0, %v4245_v4  ;;  %3511 = vmatprep.mubr.msk.f32.mxu0 %vm4244_vm0, %v4245_v4 }
  0x37   : > { %3545 = vmatmul.mubr.msk.f32.gmra.mrb[14].mxu1 %vm343_vm2, %v338_v21  ;;  %3512 = vmatmul.mubr.msk.f32.gmra.mrb[14].mxu0 %vm343_vm2, %v338_v21 }
  0x38   : > { %3547 = vmatprep.mubr.msk.f32.mxu1 %vm4244_vm0, %v4245_v4  ;;  %3514 = vmatprep.mubr.msk.f32.mxu0 %vm4244_vm0, %v4245_v4 }
  0x3b   : > { %3548 = vmatmul.mubr.msk.f32.gmra.mrb[16].mxu1 %vm343_vm2, %v339_v22  ;;  %3515 = vmatmul.mubr.msk.f32.gmra.mrb[16].mxu0 %vm343_vm2, %v339_v22 }
  0x3c   : > { %3640 = vmatprep.mubr.msk.f32.mxu1 %vm4244_vm0, %v4245_v4  ;;  %3568 = vmatprep.mubr.msk.f32.mxu0 %vm635_vm3, %v3024_v23  ;;  %v2846_v23 = vld [vmem:[%s5323_s8] sm:$0xff] }
  0x3d   : > { %2856 = vperm.xlu0 %4177, %v2846_v23   ;;  %v3085_v23 = vld [vmem:[%s5316_s1 + $0x100] sm:$0xff] }
  0x3f   : > { %3641 = vmatmul.mubr.msk.f32.vlgmr.msra.gmra.mrb[18].mxu1 %vm343_vm2, %v331_v13 }
  0x40   : > { %3643 = vmatprep.mubr.msk.f32.mxu1 %vm4244_vm0, %v4245_v4  ;;  %3955 = vmatpush3.bf16.msra.mxu1 %v3952_v61  ;;  %v3038_v61 = vld [vmem:[%s5316_s1 + $0xf0] sm:$0xff] }
  0x41   : > { %2866 = vperm.xlu0 %4177, %v2848_v30   ;;  %v3092_v30 = vld [vmem:[%s5316_s1 + $0x138] sm:$0xff] }
  0x43   : > { %3644 = vmatmul.mubr.msk.f32.gmra.mrb[20].mxu1 %vm343_vm2, %v332_v14 }
  0x44   : > { %3646 = vmatprep.mubr.msk.f32.mxu1 %vm4244_vm0, %v4245_v4 }
  0x47   : > { %3647 = vmatmul.mubr.msk.f32.gmra.mrb[22].mxu1 %vm343_vm2, %v333_v16 }
  0x48   : > { %3649 = vmatprep.mubr.msk.f32.mxu1 %vm4244_vm0, %v4245_v4 }
  0x4b   : > { %3650 = vmatmul.mubr.msk.f32.gmra.mrb[24].mxu1 %vm343_vm2, %v334_v17 }
  0x4c   : > { %3652 = vmatprep.mubr.msk.f32.mxu1 %vm4244_vm0, %v4245_v4 }
  0x4f   : > { %3653 = vmatmul.mubr.msk.f32.gmra.mrb[26].mxu1 %vm343_vm2, %v335_v18 }
  0x50   : > { %3655 = vmatprep.mubr.msk.f32.mxu1 %vm4244_vm0, %v4245_v4 }
  0x53   : > { %3656 = vmatmul.mubr.msk.f32.gmra.mrb[28].mxu1 %vm343_vm2, %v336_v19 }
  0x54   : > { %3658 = vmatprep.mubr.msk.f32.mxu1 %vm4244_vm0, %v4245_v4 }
  0x57   : > { %3659 = vmatmul.mubr.msk.f32.gmra.mrb[30].mxu1 %vm343_vm2, %v337_v20  ;;  %v1380_v20 = vld [vmem:[%s5318_s3 + $0x78] sm:$0xff] }
  0x58   : > { %3661 = vmatprep.mubr.msk.f32.mxu1 %vm4244_vm0, %v4245_v4  ;;  %1458 = vperm.xlu1 %4178, %v1380_v20   ;;  %v498_v20 = vld [vmem:[%s5316_s1 + $0x68] sm:$0xff] }
  0x5b   : > { %3662 = vmatmul.mubr.msk.f32.gmra.mrb[32].mxu1 %vm343_vm2, %v338_v21 }
  0x5c   : > { %3664 = vmatprep.mubr.msk.f32.mxu1 %vm4244_vm0, %v4245_v4 }
  0x5f   : > { %3665 = vmatmul.mubr.msk.f32.gmra.mrb[34].mxu1 %vm343_vm2, %v339_v22 }
  0xee   : > { %v574_v24 = vpop.f32.mrb[0].mxu1  ;;  %v441_v25 = vpop.f32.mrb[0].mxu0 }
  0xef   : > { %v3525_v26 = vpop.f32.mrb[1].mxu1  ;;  %v3492_v27 = vpop.f32.mrb[1].mxu0 }
  0xf0   : > { %v2847_v26 = vld [vmem:[%s5323_s8 + $0x8] sm:$0xff] }
  0xf1   : > { %v3025_v27 = vld [vmem:[%s5316_s1 + $0x88] sm:$0xff]  ;;  %2861 = vperm.xlu1 %4178, %v2847_v26   ;;  %v3088_v26 = vld [vmem:[%s5316_s1 + $0x118] sm:$0xff] }
  0xf2   : > { %v579_v31 = vpop.f32.mrb[2].mxu1  ;;  %v446_v32 = vpop.f32.mrb[2].mxu0 }
  0xf3   : > { %v3901_v34 = vpack.c.bf16 %v579_v31, %v574_v24  ;;  %v3528_v35 = vpop.f32.mrb[3].mxu1  ;;  %v4494_v36 = vpack.c.bf16 %v446_v32, %v441_v25  ;;  %v3495_v37 = vpop.f32.mrb[3].mxu0  ;;  %v2849_v32 = vld [vmem:[%s5323_s8 + $0x18] sm:$0xff] }
  0xf4   : > { %v2850_v37 = vld [vmem:[%s5323_s8 + $0x20] sm:$0xff] }
  0xf5   : > { %3902 = vmatprep.subr.bf16.mxu0 %v3901_v34  ;;  %2871 = vperm.xlu1 %4178, %v2849_v32   ;;  %v3094_v32 = vld [vmem:[%s5316_s1 + $0x148] sm:$0xff] }
  0xf6   : > { %v584_v39 = vpop.f32.mrb[4].mxu1  ;;  %3904 = vmatpush3.bf16.msra.mxu0 %v3901_v34  ;;  %v451_v40 = vpop.f32.mrb[4].mxu0  ;;  %v3028_v34 = vld [vmem:[%s5316_s1 + $0xa0] sm:$0xff]  ;;  %2876 = vperm.xlu0 %4177, %v2850_v37   ;;  %v3098_v37 = vld [vmem:[%s5316_s1 + $0x168] sm:$0xff] }
  0xf7   : > { %v3531_v42 = vpop.f32.mrb[5].mxu1  ;;  %v3498_v43 = vpop.f32.mrb[5].mxu0 }
  0xf8   : > { %v2852_v43 = vld [vmem:[%s5323_s8 + $0x30] sm:$0xff] }
  0xfa   : > { %v589_v45 = vpop.f32.mrb[6].mxu1  ;;  %v456_v46 = vpop.f32.mrb[6].mxu0  ;;  %2886 = vperm.xlu0 %4177, %v2852_v43  }
  0xfb   : > { %v3905_v48 = vpack.c.bf16 %v589_v45, %v584_v39  ;;  %v3534_v49 = vpop.f32.mrb[7].mxu1  ;;  %v4508_v50 = vpack.c.bf16 %v456_v46, %v451_v40  ;;  %v3501_v51 = vpop.f32.mrb[7].mxu0  ;;  %v2851_v39 = vld [vmem:[%s5323_s8 + $0x28] sm:$0xff]  ;;  %v2853_v45 = vld [vmem:[%s5323_s8 + $0x38] sm:$0xff] }
  0xfc   : > { %v3029_v40 = vld [vmem:[%s5316_s1 + $0xa8] sm:$0xff]  ;;  %2881 = vperm.xlu1 %4178, %v2851_v39   ;;  %v3031_v46 = vld [vmem:[%s5316_s1 + $0xb8] sm:$0xff]  ;;  %v1394_v39 = vpop.permute.xlu1 %1393 }
  0xfd   : > { %3906 = vmatprep.subr.bf16.mxu0 %v3905_v48  ;;  %v3033_v51 = vld [vmem:[%s5316_s1 + $0xc8] sm:$0xff] }
  0xfe   : > { %v594_v53 = vpop.f32.mrb[8].mxu1  ;;  %3908 = vmatpush3.bf16.msra.mxu0 %v3905_v48  ;;  %v461_v54 = vpop.f32.mrb[8].mxu0 }
  0xff   : > { %v3537_v56 = vpop.f32.mrb[9].mxu1  ;;  %v3504_v57 = vpop.f32.mrb[9].mxu0 }
 0x100   : > { %2891 = vperm.xlu1 %4178, %v2853_v45   ;;  %v3036_v56 = vld [vmem:[%s5316_s1 + $0xe0] sm:$0xff] }
 0x102   : > { %v599_v62 = vpop.f32.mrb[10].mxu1  ;;  %v466_v63 = vpop.f32.mrb[10].mxu0 }
 0x103   : > { %v3909_v1 = vpack.c.bf16 %v599_v62, %v594_v53  ;;  %v3540_v3 = vpop.f32.mrb[11].mxu1  ;;  %v4528_v4 = vpack.c.bf16 %v466_v63, %v461_v54  ;;  %v3507_v5 = vpop.f32.mrb[11].mxu0 }
 0x105   : > { %3910 = vmatprep.subr.bf16.mxu0 %v3909_v1 }
 0x106   : > { %v604_v7 = vpop.f32.mrb[12].mxu1  ;;  %3912 = vmatpush3.bf16.msra.mxu0 %v3909_v1  ;;  %v471_v8 = vpop.f32.mrb[12].mxu0  ;;  %v485_v1 = vld [vmem:[%s5316_s1] sm:$0xff] }
 0x107   : > { %v3543_v10 = vpop.f32.mrb[13].mxu1  ;;  %v3510_v11 = vpop.f32.mrb[13].mxu0 }
 0x108   : > { %v488_v10 = vld [vmem:[%s5316_s1 + $0x18] sm:$0xff]  ;;  %v489_v11 = vld [vmem:[%s5316_s1 + $0x20] sm:$0xff] }
 0x10a   : > { %v609_v13 = vpop.f32.mrb[14].mxu1  ;;  %v476_v14 = vpop.f32.mrb[14].mxu0 }
 0x10b   : > { %v3913_v16 = vpack.c.bf16 %v609_v13, %v604_v7  ;;  %v3546_v17 = vpop.f32.mrb[15].mxu1  ;;  %v3929_v18 = vpack.c.bf16 %v476_v14, %v471_v8  ;;  %v3513_v19 = vpop.f32.mrb[15].mxu0  ;;  %v487_v7 = vld [vmem:[%s5316_s1 + $0x10] sm:$0xff]  ;;  %v492_v14 = vld [vmem:[%s5316_s1 + $0x38] sm:$0xff] }
 0x10c   : > { %v491_v13 = vld [vmem:[%s5316_s1 + $0x30] sm:$0xff]  ;;  %v497_v19 = vld [vmem:[%s5316_s1 + $0x60] sm:$0xff] }
 0x10d   : > { %3914 = vmatprep.subr.bf16.mxu0 %v3913_v16  ;;  %v495_v17 = vld [vmem:[%s5316_s1 + $0x50] sm:$0xff] }
 0x10e   : > { %3916 = vmatpush3.bf16.msra.mxu0 %v3913_v16  ;;  %v614_v21 = vpop.f32.mrb[16].mxu1  ;;  %v4545_v22 = vpop.f32.mrb[16].mxu0  ;;  %v494_v16 = vld [vmem:[%s5316_s1 + $0x48] sm:$0xff] }
 0x10f   : > { %3566 = vmatprep.subr.mxu0 %v614_v21  ;;  %v3549_v24 = vpop.f32.mrb[17].mxu1  ;;  %v3516_v25 = vpop.f32.mrb[17].mxu0 }
 0x110   : > { %v3086_v24 = vld [vmem:[%s5316_s1 + $0x108] sm:$0xff]  ;;  %v3087_v25 = vld [vmem:[%s5316_s1 + $0x110] sm:$0xff] }
 0x112   : > { %3567 = vmatpush3.msra.mxu0 %v614_v21  ;;  %v1095_v29 = vpop.f32.mrb[18].mxu1  ;;  %v499_v21 = vld [vmem:[%s5316_s1 + $0x70] sm:$0xff] }
 0x113   : > { %3569 = vmatmul.mubr.msk.f32.vlgmr.msra.gmra.mrb[18].mxu0 %vm635_vm3, %v3025_v27  ;;  %3918 = vmatprep.subr.bf16.mxu0 %v4494_v36  ;;  %v3642_v31 = vpop.f32.mrb[19].mxu1  ;;  %v3089_v27 = vld [vmem:[%s5316_s1 + $0x120] sm:$0xff] }
 0x114   : > { %3920 = vmatpush3.bf16.msra.mxu0 %v4494_v36  ;;  %3571 = vmatprep.mubr.msk.f32.mxu0 %vm635_vm3, %v3026_v28  ;;  %v3090_v28 = vld [vmem:[%s5316_s1 + $0x128] sm:$0xff]  ;;  %v3093_v31 = vld [vmem:[%s5316_s1 + $0x140] sm:$0xff] }
 0x115   : > { %3922 = vmatprep.subr.bf16.mxu0 %v4508_v50 }
 0x116   : > { %v1100_v35 = vpop.f32.mrb[20].mxu1 }
 0x117   : > { %3572 = vmatmul.mubr.msk.f32.gmra.mrb[20].mxu0 %vm635_vm3, %v3027_v33  ;;  %v3936_v36 = vpack.c.bf16 %v1100_v35, %v1095_v29  ;;  %v3645_v38 = vpop.f32.mrb[21].mxu1  ;;  %v3091_v29 = vld [vmem:[%s5316_s1 + $0x130] sm:$0xff]  ;;  %v3097_v35 = vld [vmem:[%s5316_s1 + $0x160] sm:$0xff] }
 0x118   : > { %3574 = vmatprep.mubr.msk.f32.mxu0 %vm635_vm3, %v3028_v34  ;;  %3924 = vmatpush3.bf16.msra.mxu0 %v4508_v50  ;;  %v3095_v33 = vld [vmem:[%s5316_s1 + $0x150] sm:$0xff]  ;;  %v3096_v34 = vld [vmem:[%s5316_s1 + $0x158] sm:$0xff] }
 0x119   : > { %3926 = vmatprep.subr.bf16.mxu0 %v4528_v4  ;;  %v3100_v38 = vld [vmem:[%s5316_s1 + $0x178] sm:$0xff] }
 0x11a   : > { %v1105_v42 = vpop.f32.mrb[22].mxu1 }
 0x11b   : > { %3575 = vmatmul.mubr.msk.f32.gmra.mrb[22].mxu0 %vm635_vm3, %v3029_v40  ;;  %v3648_v44 = vpop.f32.mrb[23].mxu1  ;;  %v1384_v40 = vpop.permute.xlu0 %1383 }
 0x11c   : > { %3577 = vmatprep.mubr.msk.f32.mxu0 %vm635_vm3, %v3030_v41  ;;  %3928 = vmatpush3.bf16.msra.mxu0 %v4528_v4  ;;  %v1399_v41 = vpop.permute.xlu1 %1398 }
 0x11d   : > { %3930 = vmatprep.subr.bf16.mxu0 %v3929_v18 }
 0x11e   : > { %v1110_v48 = vpop.f32.mrb[24].mxu1 }
 0x11f   : > { %3578 = vmatmul.mubr.msk.f32.gmra.mrb[24].mxu0 %vm635_vm3, %v3031_v46  ;;  %v3940_v49 = vpack.c.bf16 %v1110_v48, %v1105_v42  ;;  %v3651_v50 = vpop.f32.mrb[25].mxu1  ;;  %v1389_v42 = vpop.permute.xlu0 %1388 }
 0x120   : > { %3580 = vmatprep.mubr.msk.f32.mxu0 %vm635_vm3, %v3032_v47  ;;  %3932 = vmatpush3.bf16.msra.mxu0 %v3929_v18  ;;  %v496_v18 = vld [vmem:[%s5316_s1 + $0x58] sm:$0xff]  ;;  %v1409_v43 = vpop.permute.xlu1 %1408 }
 0x121   : > { %3608 = vmatprep.subr.mxu0 %v4545_v22 }
 0x122   : > { %v1115_v53 = vpop.f32.mrb[26].mxu1 }
 0x123   : > { %3581 = vmatmul.mubr.msk.f32.gmra.mrb[26].mxu0 %vm635_vm3, %v3033_v51  ;;  %v3654_v54 = vpop.f32.mrb[27].mxu1  ;;  %v1404_v44 = vpop.permute.xlu0 %1403 }
 0x124   : > { %3583 = vmatprep.mubr.msk.f32.mxu0 %vm635_vm3, %v3034_v52  ;;  %3609 = vmatpush3.msra.mxu0 %v4545_v22  ;;  %v500_v22 = vld [vmem:[%s5316_s1 + $0x78] sm:$0xff] }
 0x125   : > { %3937 = vmatprep.subr.bf16.mxu0 %v3936_v36 }
 0x126   : > { %v1120_v57 = vpop.f32.mrb[28].mxu1 }
 0x127   : > { %3584 = vmatmul.mubr.msk.f32.gmra.mrb[28].mxu0 %vm635_vm3, %v3035_v55  ;;  %v3944_v58 = vpack.c.bf16 %v1120_v57, %v1115_v53  ;;  %v3657_v59 = vpop.f32.mrb[29].mxu1  ;;  %v1414_v52 = vpop.permute.xlu0 %1413 }
 0x128   : > { %3586 = vmatprep.mubr.msk.f32.mxu0 %vm635_vm3, %v3036_v56 }
 0x12a   : > { %v1125_v62 = vpop.f32.mrb[30].mxu1 }
 0x12b   : > { %3587 = vmatmul.mubr.msk.f32.gmra.mrb[30].mxu0 %vm635_vm3, %v3037_v60  ;;  %v3660_v63 = vpop.f32.mrb[31].mxu1 }
 0x12c   : > { %3589 = vmatprep.mubr.msk.f32.mxu0 %vm635_vm3, %v3038_v61 }
 0x12e   : > { %v1130_v3 = vpop.f32.mrb[32].mxu1 }
 0x12f   : > { %3590 = vmatmul.mubr.msk.f32.gmra.mrb[32].mxu0 %vm635_vm3, %v3039_v0  ;;  %v3948_v4 = vpack.c.bf16 %v1130_v3, %v1125_v62  ;;  %v3663_v5 = vpop.f32.mrb[33].mxu1  ;;  %v1424_v0 = vpop.permute.xlu0 %1423 }
 0x130   : > { %3610 = vmatprep.mubr.msk.f32.mxu0 %vm635_vm3, %v485_v1 }
 0x132   : > { %v1135_v8 = vpop.f32.mrb[34].mxu1 }
 0x133   : > { %3611 = vmatmul.mubr.msk.f32.vlgmr.msra.gmra.mrb[18].mxu0 %vm635_vm3, %v486_v6  ;;  %v3666_v9 = vpop.f32.mrb[35].mxu1 }
 0x134   : > { %3939 = vmatpush3.bf16.msra.mxu0 %v3936_v36  ;;  %3613 = vmatprep.mubr.msk.f32.mxu0 %vm635_vm3, %v487_v7  ;;  %v3099_v36 = vld [vmem:[%s5316_s1 + $0x170] sm:$0xff] }
 0x135   : > { %3941 = vmatprep.subr.bf16.mxu0 %v3940_v49 }
 0x137   : > { %3614 = vmatmul.mubr.msk.f32.gmra.mrb[20].mxu0 %vm635_vm3, %v488_v10 }
 0x138   : > { %3616 = vmatprep.mubr.msk.f32.mxu0 %vm635_vm3, %v489_v11  ;;  %3943 = vmatpush3.bf16.msra.mxu0 %v3940_v49  ;;  %v1419_v49 = vpop.permute.xlu1 %1418  ;;  %v1434_v11 = vpop.permute.xlu0 %1433 }
 0x139   : > { %3945 = vmatprep.subr.bf16.mxu0 %v3944_v58 }
 0x13b   : > { %3617 = vmatmul.mubr.msk.f32.gmra.mrb[22].mxu0 %vm635_vm3, %v490_v12 }
 0x13c   : > { %3619 = vmatprep.mubr.msk.f32.mxu0 %vm635_vm3, %v491_v13  ;;  %3947 = vmatpush3.bf16.msra.mxu0 %v3944_v58  ;;  %v1429_v62 = vpop.permute.xlu1 %1428 }
 0x13d   : > { %3949 = vmatprep.subr.bf16.mxu0 %v3948_v4 }
 0x13f   : > { %3620 = vmatmul.mubr.msk.f32.gmra.mrb[24].mxu0 %vm635_vm3, %v492_v14 }
 0x140   : > { %3622 = vmatprep.mubr.msk.f32.mxu0 %vm635_vm3, %v493_v15  ;;  %3951 = vmatpush3.bf16.msra.mxu0 %v3948_v4 }
 0x141   : > { %3683 = vmatprep.subr.mxu0 %v1135_v8 }
 0x143   : > { %3623 = vmatmul.mubr.msk.f32.gmra.mrb[26].mxu0 %vm635_vm3, %v494_v16 }
 0x144   : > { %3625 = vmatprep.mubr.msk.f32.mxu0 %vm635_vm3, %v495_v17  ;;  %3684 = vmatpush3.msra.mxu0 %v1135_v8  ;;  %v1439_v8 = vpop.permute.xlu1 %1438 }
 0x147   : > { %3626 = vmatmul.mubr.msk.f32.gmra.mrb[28].mxu0 %vm635_vm3, %v496_v18 }
 0x148   : > { %3628 = vmatprep.mubr.msk.f32.mxu0 %vm635_vm3, %v497_v19 }
 0x14b   : > { %3629 = vmatmul.mubr.msk.f32.gmra.mrb[30].mxu0 %vm635_vm3, %v498_v20 }
 0x14c   : > { %3631 = vmatprep.mubr.msk.f32.mxu0 %vm635_vm3, %v499_v21  ;;  %v1449_v21 = vpop.permute.xlu1 %1448 }
 0x14f   : > { %3632 = vmatmul.mubr.msk.f32.gmra.mrb[32].mxu0 %vm635_vm3, %v500_v22 }
 0x150   : > { %3685 = vmatprep.mubr.msk.f32.mxu0 %vm635_vm3, %v3085_v23  ;;  %v1444_v23 = vpop.permute.xlu0 %1443 }
 0x153   : > { %3686 = vmatmul.mubr.msk.f32.vlgmr.msra.gmra.mrb[18].mxu0 %vm635_vm3, %v3086_v24 }
 0x154   : > { %3688 = vmatprep.mubr.msk.f32.mxu0 %vm635_vm3, %v3087_v25 }
 0x157   : > { %3689 = vmatmul.mubr.msk.f32.gmra.mrb[20].mxu0 %vm635_vm3, %v3088_v26 }
 0x158   : > { %3691 = vmatprep.mubr.msk.f32.mxu0 %vm635_vm3, %v3089_v27 }
 0x15b   : > { %3692 = vmatmul.mubr.msk.f32.gmra.mrb[22].mxu0 %vm635_vm3, %v3090_v28 }
 0x15c   : > { %3694 = vmatprep.mubr.msk.f32.mxu0 %vm635_vm3, %v3091_v29 }
 0x15f   : > { %3695 = vmatmul.mubr.msk.f32.gmra.mrb[24].mxu0 %vm635_vm3, %v3092_v30  ;;  %v1459_v30 = vpop.permute.xlu1 %1458 }
 0x160   : > { %3697 = vmatprep.mubr.msk.f32.mxu0 %vm635_vm3, %v3093_v31 }
 0x163   : > { %3698 = vmatmul.mubr.msk.f32.gmra.mrb[26].mxu0 %vm635_vm3, %v3094_v32 }
 0x164   : > { %3700 = vmatprep.mubr.msk.f32.mxu0 %vm635_vm3, %v3095_v33  ;;  %v1454_v33 = vpop.permute.xlu0 %1453 }
 0x167   : > { %3701 = vmatmul.mubr.msk.f32.gmra.mrb[28].mxu0 %vm635_vm3, %v3096_v34 }
 0x168   : > { %3703 = vmatprep.mubr.msk.f32.mxu0 %vm635_vm3, %v3097_v35 }
 0x16b   : > { %3704 = vmatmul.mubr.msk.f32.gmra.mrb[30].mxu0 %vm635_vm3, %v3098_v37 }
 0x16c   : > { %3706 = vmatprep.mubr.msk.f32.mxu0 %vm635_vm3, %v3099_v36 }
 0x16f   : > { %3707 = vmatmul.mubr.msk.f32.gmra.mrb[32].mxu0 %vm635_vm3, %v3100_v38 }
 0x226   : > { %v3687_v45 = vpop.f32.mrb[18].mxu0 }
 0x227   : > { %v1462_v46 = vadd.f32 %v3687_v45, %v1389_v42  ;;  %v1270_v47 = vpop.f32.mrb[19].mxu0 }
 0x228   : > { %v1461_v48 = vadd.f32 %v1384_v40, %v1270_v47  ;;  %v1493_v40 = vld [vmem:[%s5319_s4] sm:$0xff] }
 0x229   : > { %v1478_v53 = vmax.f32 %v1462_v46, 0.0 }
 0x22a   : > { %v1477_v50 = vmax.f32 %v1461_v48, 0.0  ;;  %v3690_v51 = vpop.f32.mrb[20].mxu0 }
 0x22b   : > { %v1464_v54 = vadd.f32 %v3690_v51, %v1399_v41  ;;  %v1280_v55 = vpop.f32.mrb[21].mxu0 }
 0x22c   : > { %v1463_v56 = vadd.f32 %v1394_v39, %v1280_v55  ;;  %3713 = vmatprep.mubr.msk.f32.mxu1 %vm1513_vm4, %v1477_v50 }
 0x22d   : > { %3714 = vmatmul.mubr.msk.f32.vlgmr.msra.gmra.mrb[36].mxu1 %vm1513_vm4, %v1478_v53  ;;  %v1480_v59 = vmax.f32 %v1464_v54, 0.0 }
 0x22e   : > { %v1479_v57 = vmax.f32 %v1463_v56, 0.0  ;;  %v3693_v58 = vpop.f32.mrb[22].mxu0 }
 0x22f   : > { %v1466_v60 = vadd.f32 %v3693_v58, %v1409_v43  ;;  %v1290_v61 = vpop.f32.mrb[23].mxu0 }
 0x230   : > { %v1465_v63 = vadd.f32 %v1404_v44, %v1290_v61  ;;  %3716 = vmatprep.mubr.msk.f32.mxu1 %vm1513_vm4, %v1479_v57 }
 0x231   : > { %3717 = vmatmul.mubr.msk.f32.gmra.mrb[38].mxu1 %vm1513_vm4, %v1480_v59  ;;  %v1482_v4 = vmax.f32 %v1466_v60, 0.0 }
 0x232   : > { %v1481_v1 = vmax.f32 %v1465_v63, 0.0  ;;  %v3696_v3 = vpop.f32.mrb[24].mxu0  ;;  %v3153_v63 = vld [vmem:[%s5322_s7 + $0x20] sm:$0xff] }
 0x233   : > { %v1468_v5 = vadd.f32 %v3696_v3, %v1419_v49  ;;  %v1300_v6 = vpop.f32.mrb[25].mxu0 }
 0x234   : > { %v1467_v7 = vadd.f32 %v1414_v52, %v1300_v6  ;;  %3719 = vmatprep.mubr.msk.f32.mxu1 %vm1513_vm4, %v1481_v1  ;;  %v1495_v6 = vld [vmem:[%s5319_s4 + $0x10] sm:$0xff] }
 0x235   : > { %3720 = vmatmul.mubr.msk.f32.gmra.mrb[40].mxu1 %vm1513_vm4, %v1482_v4  ;;  %v1484_v12 = vmax.f32 %v1468_v5, 0.0  ;;  %v1494_v5 = vld [vmem:[%s5319_s4 + $0x8] sm:$0xff] }
 0x236   : > { %v1483_v9 = vmax.f32 %v1467_v7, 0.0  ;;  %v3699_v10 = vpop.f32.mrb[26].mxu0  ;;  %v3154_v7 = vld [vmem:[%s5322_s7 + $0x28] sm:$0x3] }
 0x237   : > { %v1470_v13 = vadd.f32 %v3699_v10, %v1429_v62  ;;  %v1310_v14 = vpop.f32.mrb[27].mxu0  ;;  %v3152_v62 = vld [vmem:[%s5322_s7 + $0x18] sm:$0xff]  ;;  %v1498_v10 = vld [vmem:[%s5319_s4 + $0x28] sm:$0xff] }
 0x238   : > { %v1469_v15 = vadd.f32 %v1424_v0, %v1310_v14  ;;  %3722 = vmatprep.mubr.msk.f32.mxu1 %vm1513_vm4, %v1483_v9  ;;  %v3992_v4 = vpack.c.bf16 %v3153_v63, %v3152_v62  ;;  %v1497_v9 = vld [vmem:[%s5319_s4 + $0x20] sm:$0xff]  ;;  %v1502_v14 = vld [vmem:[%s5319_s4 + $0x48] sm:$0xff] }
 0x239   : > { %3723 = vmatmul.mubr.msk.f32.gmra.mrb[42].mxu1 %vm1513_vm4, %v1484_v12  ;;  %v1486_v18 = vmax.f32 %v1470_v13, 0.0  ;;  %v1500_v12 = vld [vmem:[%s5319_s4 + $0x38] sm:$0xff]  ;;  %v1501_v13 = vld [vmem:[%s5319_s4 + $0x40] sm:$0xff] }
 0x23a   : > { %v1485_v16 = vmax.f32 %v1469_v15, 0.0  ;;  %v3702_v17 = vpop.f32.mrb[28].mxu0  ;;  %v1503_v15 = vld [vmem:[%s5319_s4 + $0x50] sm:$0xff] }
 0x23b   : > { %v1472_v19 = vadd.f32 %v3702_v17, %v1439_v8  ;;  %v1320_v20 = vpop.f32.mrb[29].mxu0  ;;  %v1496_v8 = vld [vmem:[%s5319_s4 + $0x18] sm:$0xff]  ;;  %v1505_v17 = vld [vmem:[%s5319_s4 + $0x60] sm:$0xff] }
 0x23c   : > { %v1471_v22 = vadd.f32 %v1434_v11, %v1320_v20  ;;  %3725 = vmatprep.mubr.msk.f32.mxu1 %vm1513_vm4, %v1485_v16  ;;  %v1499_v11 = vld [vmem:[%s5319_s4 + $0x30] sm:$0xff]  ;;  %v1504_v16 = vld [vmem:[%s5319_s4 + $0x58] sm:$0xff] }
 0x23d   : > { %3726 = vmatmul.mubr.msk.f32.gmra.mrb[44].mxu1 %vm1513_vm4, %v1486_v18  ;;  %v1488_v26 = vmax.f32 %v1472_v19, 0.0  ;;  %v1506_v18 = vld [vmem:[%s5319_s4 + $0x68] sm:$0xff]  ;;  %v1507_v19 = vld [vmem:[%s5319_s4 + $0x70] sm:$0xff]  ;;  %v1508_v20 = vld [vmem:[%s5319_s4 + $0x78] sm:$0xff] }
 0x23e   : > { %v1487_v24 = vmax.f32 %v1471_v22, 0.0  ;;  %v3705_v25 = vpop.f32.mrb[30].mxu0  ;;  %v1510_v22 = vld [vmem:[%s5319_s4 + $0x88] sm:$0xff] }
 0x23f   : > { %v1474_v27 = vadd.f32 %v3705_v25, %v1449_v21  ;;  %v1330_v28 = vpop.f32.mrb[31].mxu0  ;;  %v1509_v21 = vld [vmem:[%s5319_s4 + $0x80] sm:$0xff] }
 0x240   : > { %v1473_v29 = vadd.f32 %v1444_v23, %v1330_v28  ;;  %3728 = vmatprep.mubr.msk.f32.mxu1 %vm1513_vm4, %v1487_v24  ;;  %v1862_v23 = vld [vmem:[%s5322_s7] sm:$0xff]  ;;  %v1863_v24 = vld [vmem:[%s5322_s7 + $0x8] sm:$0xff] }
 0x241   : > { %3729 = vmatmul.mubr.msk.f32.gmra.mrb[46].mxu1 %vm1513_vm4, %v1488_v26  ;;  %v1490_v34 = vmax.f32 %v1474_v27, 0.0  ;;  %v3988_v25 = vpack.c.bf16 %v1863_v24, %v1862_v23  ;;  %v1864_v26 = vld [vmem:[%s5322_s7 + $0x10] sm:$0x3] }
 0x242   : > { %v1489_v31 = vmax.f32 %v1473_v29, 0.0  ;;  %v3708_v32 = vpop.f32.mrb[32].mxu0 }
 0x243   : > { %v1476_v35 = vadd.f32 %v3708_v32, %v1459_v30  ;;  %v1340_v37 = vpop.f32.mrb[33].mxu0  ;;  %3989 = vmatprep.subr.bf16.mxu0 %v3988_v25 }
 0x244   : > { %v1475_v36 = vadd.f32 %v1454_v33, %v1340_v37  ;;  %3731 = vmatprep.mubr.msk.f32.mxu1 %vm1513_vm4, %v1489_v31  ;;  %3991 = vmatpush3.bf16.msra.mxu0 %v3988_v25 }
 0x245   : > { %3732 = vmatmul.mubr.msk.f32.gmra.mrb[48].mxu1 %vm1513_vm4, %v1490_v34  ;;  %v1492_v39 = vmax.f32 %v1476_v35, 0.0  ;;  %3800 = vmatprep.subr.msk.mxu0 %vm371_vm1, %v1864_v26 }
 0x246   : > { %v1491_v38 = vmax.f32 %v1475_v36, 0.0 }
 0x248   : > { %3734 = vmatprep.mubr.msk.f32.mxu1 %vm1513_vm4, %v1491_v38  ;;  %3801 = vmatpush3.msk.msra.mxu0 %vm371_vm1, %v1864_v26 }
 0x249   : > { %3735 = vmatmul.mubr.msk.f32.gmra.mrb[50].mxu1 %vm1513_vm4, %v1492_v39  ;;  %3996 = vmatprep.subr.bf16.mxu0 %v4243_v2 }
 0x24a   : > { %3769 = vmatprep.mubr.f32.mxu1 %v1493_v40 }
 0x300   : > { %v3715_v41 = vpop.f32.mrb[36].mxu1 }
 0x301   : > { %v1628_v42 = vpop.f32.mrb[37].mxu1 }
 0x302   : > { %v3956_v43 = vpack.c.bf16 %v3715_v41, %v1628_v42 }
 0x304   : > { %v3718_v44 = vpop.f32.mrb[38].mxu1  ;;  %3957 = vmatprep.subr.bf16.mxu1 %v3956_v43 }
 0x305   : > { %v1638_v45 = vpop.f32.mrb[39].mxu1  ;;  %3959 = vmatpush3.bf16.msra.mxu1 %v3956_v43 }
 0x306   : > { %v3960_v46 = vpack.c.bf16 %v3718_v44, %v1638_v45  ;;  %v3175_v45 = vld [vmem:[%s5321_s6 + $0x88] sm:$0xff] }
 0x308   : > { %v3721_v47 = vpop.f32.mrb[40].mxu1  ;;  %3961 = vmatprep.subr.bf16.mxu1 %v3960_v46 }
 0x309   : > { %v1648_v48 = vpop.f32.mrb[41].mxu1  ;;  %3963 = vmatpush3.bf16.msra.mxu1 %v3960_v46  ;;  %v2078_v46 = vld [vmem:[%s5321_s6 + $0x8] sm:$0xff] }
 0x30a   : > { %v3964_v49 = vpack.c.bf16 %v3721_v47, %v1648_v48 }
 0x30c   : > { %v3724_v50 = vpop.f32.mrb[42].mxu1  ;;  %3965 = vmatprep.subr.bf16.mxu1 %v3964_v49 }
 0x30d   : > { %v1658_v51 = vpop.f32.mrb[43].mxu1  ;;  %3967 = vmatpush3.bf16.msra.mxu1 %v3964_v49 }
 0x30e   : > { %v3968_v52 = vpack.c.bf16 %v3724_v50, %v1658_v51 }
 0x310   : > { %v3727_v53 = vpop.f32.mrb[44].mxu1  ;;  %3969 = vmatprep.subr.bf16.mxu1 %v3968_v52 }
 0x311   : > { %v1668_v54 = vpop.f32.mrb[45].mxu1  ;;  %3971 = vmatpush3.bf16.msra.mxu1 %v3968_v52 }
 0x312   : > { %v3972_v55 = vpack.c.bf16 %v3727_v53, %v1668_v54 }
 0x314   : > { %v3730_v56 = vpop.f32.mrb[46].mxu1  ;;  %3973 = vmatprep.subr.bf16.mxu1 %v3972_v55 }
 0x315   : > { %v1678_v57 = vpop.f32.mrb[47].mxu1  ;;  %3975 = vmatpush3.bf16.msra.mxu1 %v3972_v55 }
 0x316   : > { %v3976_v58 = vpack.c.bf16 %v3730_v56, %v1678_v57 }
 0x318   : > { %v3733_v59 = vpop.f32.mrb[48].mxu1  ;;  %3977 = vmatprep.subr.bf16.mxu1 %v3976_v58 }
 0x319   : > { %v1688_v60 = vpop.f32.mrb[49].mxu1  ;;  %3979 = vmatpush3.bf16.msra.mxu1 %v3976_v58 }
 0x31a   : > { %v3980_v61 = vpack.c.bf16 %v3733_v59, %v1688_v60 }
 0x31c   : > { %v3736_v0 = vpop.f32.mrb[50].mxu1  ;;  %3981 = vmatprep.subr.bf16.mxu1 %v3980_v61 }
 0x31d   : > { %v1698_v1 = vpop.f32.mrb[51].mxu1  ;;  %3983 = vmatpush3.bf16.msra.mxu1 %v3980_v61 }
 0x31e   : > { %v3984_v3 = vpack.c.bf16 %v3736_v0, %v1698_v1 }
 0x320   : > { %3985 = vmatprep.subr.bf16.mxu1 %v3984_v3 }
 0x321   : > { %3987 = vmatpush3.bf16.msra.mxu1 %v3984_v3 }
 0x322   : > { %3993 = vmatprep.subr.bf16.mxu1 %v3992_v4 }
 0x324   : > { %3770 = vmatmul.mubr.f32.vlgmr.msra.gmra.mrb[52].mxu1 %v1494_v5 }
 0x325   : > { %3772 = vmatprep.mubr.f32.mxu1 %v1495_v6  ;;  %3995 = vmatpush3.bf16.msra.mxu1 %v3992_v4 }
 0x326   : > { %3833 = vmatprep.subr.msk.mxu1 %vm371_vm1, %v3154_v7 }
 0x328   : > { %3773 = vmatmul.mubr.f32.gmra.mrb[54].mxu1 %v1496_v8 }
 0x329   : > { %3775 = vmatprep.mubr.f32.mxu1 %v1497_v9  ;;  %3834 = vmatpush3.msk.msra.mxu1 %vm371_vm1, %v3154_v7 }
 0x32a   : > { %4023 = vmatprep.subr.bf16.mxu1 %v4243_v2 }
 0x32c   : > { %3776 = vmatmul.mubr.f32.gmra.mrb[56].mxu1 %v1498_v10 }
 0x32d   : > { %3778 = vmatprep.mubr.f32.mxu1 %v1499_v11 }
 0x330   : > { %3779 = vmatmul.mubr.f32.gmra.mrb[58].mxu1 %v1500_v12 }
 0x331   : > { %3781 = vmatprep.mubr.f32.mxu1 %v1501_v13 }
 0x334   : > { %3782 = vmatmul.mubr.f32.gmra.mrb[60].mxu1 %v1502_v14 }
 0x335   : > { %3784 = vmatprep.mubr.f32.mxu1 %v1503_v15 }
 0x338   : > { %3785 = vmatmul.mubr.f32.gmra.mrb[62].mxu1 %v1504_v16 }
 0x339   : > { %3787 = vmatprep.mubr.f32.mxu1 %v1505_v17 }
 0x33c   : > { %3788 = vmatmul.mubr.f32.gmra.mrb[64].mxu1 %v1506_v18 }
 0x33d   : > { %3790 = vmatprep.mubr.f32.mxu1 %v1507_v19 }
 0x340   : > { %3791 = vmatmul.mubr.f32.gmra.mrb[66].mxu1 %v1508_v20 }
 0x341   : > { %3793 = vmatprep.mubr.f32.mxu1 %v1509_v21 }
 0x344   : > { %3794 = vmatmul.mubr.f32.gmra.mrb[68].mxu1 %v1510_v22 }
 0x3f7   : > { %v4861_v27 = vpop.f32.mrb[52].mxu1 }
 0x3f8   : > { %v4863_v28 = vpop.f32.mrb[53].mxu1 }
 0x3f9   : > { %3835 = vmatprep.mubr.msk.f32.mxu1 %vm343_vm2, %v4863_v28  ;;  %3802 = vmatprep.mubr.msk.f32.mxu0 %vm343_vm2, %v4863_v28 }
 0x3fa   : > { %3836 = vmatmul.mubr.msk.f32.vlgmr.msra.gmra.mrb[70].mxu1 %vm343_vm2, %v4861_v27  ;;  %3803 = vmatmul.mubr.msk.f32.vlgmr.msra.gmra.mrb[34].mxu0 %vm343_vm2, %v4861_v27 }
 0x3fb   : > { %v4873_v29 = vpop.f32.mrb[54].mxu1 }
 0x3fc   : > { %v4875_v30 = vpop.f32.mrb[55].mxu1 }
 0x3fd   : > { %3838 = vmatprep.mubr.msk.f32.mxu1 %vm343_vm2, %v4875_v30  ;;  %3805 = vmatprep.mubr.msk.f32.mxu0 %vm343_vm2, %v4875_v30 }
 0x3fe   : > { %3839 = vmatmul.mubr.msk.f32.gmra.mrb[72].mxu1 %vm343_vm2, %v4873_v29  ;;  %3806 = vmatmul.mubr.msk.f32.gmra.mrb[36].mxu0 %vm343_vm2, %v4873_v29 }
 0x3ff   : > { %v4885_v31 = vpop.f32.mrb[56].mxu1 }
 0x400   : > { %v4887_v32 = vpop.f32.mrb[57].mxu1 }
 0x401   : > { %3841 = vmatprep.mubr.msk.f32.mxu1 %vm343_vm2, %v4887_v32  ;;  %3808 = vmatprep.mubr.msk.f32.mxu0 %vm343_vm2, %v4887_v32 }
 0x402   : > { %3842 = vmatmul.mubr.msk.f32.gmra.mrb[74].mxu1 %vm343_vm2, %v4885_v31  ;;  %3809 = vmatmul.mubr.msk.f32.gmra.mrb[38].mxu0 %vm343_vm2, %v4885_v31 }
 0x403   : > { %v4897_v33 = vpop.f32.mrb[58].mxu1 }
 0x404   : > { %v4899_v34 = vpop.f32.mrb[59].mxu1 }
 0x405   : > { %3844 = vmatprep.mubr.msk.f32.mxu1 %vm343_vm2, %v4899_v34  ;;  %3811 = vmatprep.mubr.msk.f32.mxu0 %vm343_vm2, %v4899_v34 }
 0x406   : > { %3845 = vmatmul.mubr.msk.f32.gmra.mrb[76].mxu1 %vm343_vm2, %v4897_v33  ;;  %3812 = vmatmul.mubr.msk.f32.gmra.mrb[40].mxu0 %vm343_vm2, %v4897_v33 }
 0x407   : > { %v4909_v35 = vpop.f32.mrb[60].mxu1 }
 0x408   : > { %v4911_v37 = vpop.f32.mrb[61].mxu1 }
 0x409   : > { %3847 = vmatprep.mubr.msk.f32.mxu1 %vm343_vm2, %v4911_v37  ;;  %3814 = vmatprep.mubr.msk.f32.mxu0 %vm343_vm2, %v4911_v37 }
 0x40a   : > { %3848 = vmatmul.mubr.msk.f32.gmra.mrb[78].mxu1 %vm343_vm2, %v4909_v35  ;;  %3815 = vmatmul.mubr.msk.f32.gmra.mrb[42].mxu0 %vm343_vm2, %v4909_v35 }
 0x40b   : > { %v4921_v36 = vpop.f32.mrb[62].mxu1 }
 0x40c   : > { %v4923_v38 = vpop.f32.mrb[63].mxu1 }
 0x40d   : > { %3850 = vmatprep.mubr.msk.f32.mxu1 %vm343_vm2, %v4923_v38  ;;  %3817 = vmatprep.mubr.msk.f32.mxu0 %vm343_vm2, %v4923_v38 }
 0x40e   : > { %3851 = vmatmul.mubr.msk.f32.gmra.mrb[80].mxu1 %vm343_vm2, %v4921_v36  ;;  %3818 = vmatmul.mubr.msk.f32.gmra.mrb[44].mxu0 %vm343_vm2, %v4921_v36 }
 0x40f   : > { %v4933_v39 = vpop.f32.mrb[64].mxu1 }
 0x410   : > { %v4935_v40 = vpop.f32.mrb[65].mxu1 }
 0x411   : > { %3853 = vmatprep.mubr.msk.f32.mxu1 %vm343_vm2, %v4935_v40  ;;  %3820 = vmatprep.mubr.msk.f32.mxu0 %vm343_vm2, %v4935_v40 }
 0x412   : > { %3854 = vmatmul.mubr.msk.f32.gmra.mrb[82].mxu1 %vm343_vm2, %v4933_v39  ;;  %3821 = vmatmul.mubr.msk.f32.gmra.mrb[46].mxu0 %vm343_vm2, %v4933_v39 }
 0x413   : > { %v4945_v41 = vpop.f32.mrb[66].mxu1 }
 0x414   : > { %v4947_v42 = vpop.f32.mrb[67].mxu1 }
 0x415   : > { %3856 = vmatprep.mubr.msk.f32.mxu1 %vm343_vm2, %v4947_v42  ;;  %3823 = vmatprep.mubr.msk.f32.mxu0 %vm343_vm2, %v4947_v42 }
 0x416   : > { %3857 = vmatmul.mubr.msk.f32.gmra.mrb[84].mxu1 %vm343_vm2, %v4945_v41  ;;  %3824 = vmatmul.mubr.msk.f32.gmra.mrb[48].mxu0 %vm343_vm2, %v4945_v41 }
 0x417   : > { %v4957_v43 = vpop.f32.mrb[68].mxu1 }
 0x418   : > { %v4959_v44 = vpop.f32.mrb[69].mxu1 }
 0x419   : > { %3859 = vmatprep.mubr.msk.f32.mxu1 %vm343_vm2, %v4959_v44  ;;  %3826 = vmatprep.mubr.msk.f32.mxu0 %vm343_vm2, %v4959_v44 }
 0x41a   : > { %3860 = vmatmul.mubr.msk.f32.gmra.mrb[86].mxu1 %vm343_vm2, %v4957_v43  ;;  %3827 = vmatmul.mubr.msk.f32.gmra.mrb[50].mxu0 %vm343_vm2, %v4957_v43 }
 0x41b   : > { %3190 = vmatprep.mubr.msk.f32.mxu0 %vm1513_vm4, %v3175_v45  ;;  %3198 = vmatprep.mubr.msk.f32.mxu1 %vm1513_vm4, %v2078_v46 }
 0x4cd   : > { %v3837_v47 = vpop.f32.mrb[70].mxu1  ;;  %v3804_v48 = vpop.f32.mrb[34].mxu0 }
 0x4ce   : > { %v2166_v49 = vpop.f32.mrb[71].mxu1  ;;  %v1988_v50 = vpop.f32.mrb[35].mxu0 }
 0x4cf   : > { %v3997_v51 = vpack.c.bf16 %v3837_v47, %v2166_v49  ;;  %v4024_v52 = vpack.c.bf16 %v3804_v48, %v1988_v50  ;;  %v3206_v50 = vld [vmem:[%s5322_s7 + $0x30] sm:$0xff] }
 0x4d1   : > { %v3840_v53 = vpop.f32.mrb[72].mxu1  ;;  %3998 = vmatpush1.bf16.msra.mxu0 %v3997_v51  ;;  %v3807_v54 = vpop.f32.mrb[36].mxu0  ;;  %4025 = vmatpush1.bf16.msra.mxu1 %v4024_v52  ;;  %v3207_v51 = vld [vmem:[%s5322_s7 + $0x38] sm:$0xff] }
 0x4d2   : > { %v2176_v55 = vpop.f32.mrb[73].mxu1  ;;  %3999 = vmatprep.subr.bf16.mxu0 %v4243_v2  ;;  %v1998_v56 = vpop.f32.mrb[37].mxu0  ;;  %4026 = vmatprep.subr.bf16.mxu1 %v4243_v2 }
 0x4d3   : > { %v4000_v57 = vpack.c.bf16 %v3840_v53, %v2176_v55  ;;  %v4027_v58 = vpack.c.bf16 %v3807_v54, %v1998_v56  ;;  %v4050_v56 = vpack.c.bf16 %v3207_v51, %v3206_v50 }
 0x4d5   : > { %v3843_v59 = vpop.f32.mrb[74].mxu1  ;;  %4001 = vmatpush1.bf16.msra.mxu0 %v4000_v57  ;;  %v3810_v60 = vpop.f32.mrb[38].mxu0  ;;  %4028 = vmatpush1.bf16.msra.mxu1 %v4027_v58 }
 0x4d6   : > { %v2186_v61 = vpop.f32.mrb[75].mxu1  ;;  %4002 = vmatprep.subr.bf16.mxu0 %v4243_v2  ;;  %v2008_v62 = vpop.f32.mrb[39].mxu0  ;;  %4029 = vmatprep.subr.bf16.mxu1 %v4243_v2 }
 0x4d7   : > { %v4003_v63 = vpack.c.bf16 %v3843_v59, %v2186_v61  ;;  %v4030_v0 = vpack.c.bf16 %v3810_v60, %v2008_v62  ;;  %v3174_v59 = vld [vmem:[%s5321_s6 + $0x80] sm:$0xff]  ;;  %v3177_v61 = vld [vmem:[%s5321_s6 + $0x98] sm:$0xff] }
 0x4d8   : > { %v2077_v60 = vld [vmem:[%s5321_s6] sm:$0xff]  ;;  %v2080_v62 = vld [vmem:[%s5321_s6 + $0x18] sm:$0xff] }
 0x4d9   : > { %v3846_v1 = vpop.f32.mrb[76].mxu1  ;;  %4004 = vmatpush1.bf16.msra.mxu0 %v4003_v63  ;;  %v3813_v3 = vpop.f32.mrb[40].mxu0  ;;  %4031 = vmatpush1.bf16.msra.mxu1 %v4030_v0  ;;  %v3208_v63 = vld [vmem:[%s5322_s7 + $0x40] sm:$0x3]  ;;  %v3176_v0 = vld [vmem:[%s5321_s6 + $0x90] sm:$0xff] }
 0x4da   : > { %v2196_v4 = vpop.f32.mrb[77].mxu1  ;;  %4005 = vmatprep.subr.bf16.mxu0 %v4243_v2  ;;  %v2018_v5 = vpop.f32.mrb[41].mxu0  ;;  %4032 = vmatprep.subr.bf16.mxu1 %v4243_v2 }
 0x4db   : > { %v4006_v6 = vpack.c.bf16 %v3846_v1, %v2196_v4  ;;  %v4033_v7 = vpack.c.bf16 %v3813_v3, %v2018_v5  ;;  %v2079_v1 = vld [vmem:[%s5321_s6 + $0x10] sm:$0xff]  ;;  %v3179_v3 = vld [vmem:[%s5321_s6 + $0xa8] sm:$0xff]  ;;  %v3178_v5 = vld [vmem:[%s5321_s6 + $0xa0] sm:$0xff] }
 0x4dc   : > { %v2082_v4 = vld [vmem:[%s5321_s6 + $0x28] sm:$0xff] }
 0x4dd   : > { %v3849_v8 = vpop.f32.mrb[78].mxu1  ;;  %4007 = vmatpush1.bf16.msra.mxu0 %v4006_v6  ;;  %v3816_v9 = vpop.f32.mrb[42].mxu0  ;;  %4034 = vmatpush1.bf16.msra.mxu1 %v4033_v7  ;;  %v2081_v6 = vld [vmem:[%s5321_s6 + $0x20] sm:$0xff]  ;;  %v3181_v7 = vld [vmem:[%s5321_s6 + $0xb8] sm:$0xff] }
 0x4de   : > { %v2206_v10 = vpop.f32.mrb[79].mxu1  ;;  %4008 = vmatprep.subr.bf16.mxu0 %v4243_v2  ;;  %v2028_v11 = vpop.f32.mrb[43].mxu0  ;;  %4035 = vmatprep.subr.bf16.mxu1 %v4243_v2 }
 0x4df   : > { %v4009_v12 = vpack.c.bf16 %v3849_v8, %v2206_v10  ;;  %v4036_v13 = vpack.c.bf16 %v3816_v9, %v2028_v11  ;;  %v2084_v8 = vld [vmem:[%s5321_s6 + $0x38] sm:$0xff]  ;;  %v3180_v9 = vld [vmem:[%s5321_s6 + $0xb0] sm:$0xff]  ;;  %v3183_v11 = vld [vmem:[%s5321_s6 + $0xc8] sm:$0xff] }
 0x4e0   : > { %v2083_v10 = vld [vmem:[%s5321_s6 + $0x30] sm:$0xff] }
 0x4e1   : > { %v3852_v14 = vpop.f32.mrb[80].mxu1  ;;  %4010 = vmatpush1.bf16.msra.mxu0 %v4009_v12  ;;  %v3819_v15 = vpop.f32.mrb[44].mxu0  ;;  %4037 = vmatpush1.bf16.msra.mxu1 %v4036_v13  ;;  %v2086_v12 = vld [vmem:[%s5321_s6 + $0x48] sm:$0xff]  ;;  %v3182_v13 = vld [vmem:[%s5321_s6 + $0xc0] sm:$0xff] }
 0x4e2   : > { %v2216_v16 = vpop.f32.mrb[81].mxu1  ;;  %4011 = vmatprep.subr.bf16.mxu0 %v4243_v2  ;;  %v2038_v17 = vpop.f32.mrb[45].mxu0  ;;  %4038 = vmatprep.subr.bf16.mxu1 %v4243_v2 }
 0x4e3   : > { %v4012_v18 = vpack.c.bf16 %v3852_v14, %v2216_v16  ;;  %v4039_v19 = vpack.c.bf16 %v3819_v15, %v2038_v17  ;;  %v2085_v14 = vld [vmem:[%s5321_s6 + $0x40] sm:$0xff]  ;;  %v3185_v15 = vld [vmem:[%s5321_s6 + $0xd8] sm:$0xff]  ;;  %v3184_v17 = vld [vmem:[%s5321_s6 + $0xd0] sm:$0xff] }
 0x4e4   : > { %v2088_v16 = vld [vmem:[%s5321_s6 + $0x58] sm:$0xff] }
 0x4e5   : > { %v3855_v20 = vpop.f32.mrb[82].mxu1  ;;  %4013 = vmatpush1.bf16.msra.mxu0 %v4012_v18  ;;  %v3822_v21 = vpop.f32.mrb[46].mxu0  ;;  %4040 = vmatpush1.bf16.msra.mxu1 %v4039_v19  ;;  %v2087_v18 = vld [vmem:[%s5321_s6 + $0x50] sm:$0xff]  ;;  %v3187_v19 = vld [vmem:[%s5321_s6 + $0xe8] sm:$0xff] }
 0x4e6   : > { %v2226_v22 = vpop.f32.mrb[83].mxu1  ;;  %4014 = vmatprep.subr.bf16.mxu0 %v4243_v2  ;;  %v2048_v23 = vpop.f32.mrb[47].mxu0  ;;  %4041 = vmatprep.subr.bf16.mxu1 %v4243_v2 }
 0x4e7   : > { %v4015_v24 = vpack.c.bf16 %v3855_v20, %v2226_v22  ;;  %v4042_v25 = vpack.c.bf16 %v3822_v21, %v2048_v23  ;;  %v2090_v20 = vld [vmem:[%s5321_s6 + $0x68] sm:$0xff]  ;;  %v3186_v21 = vld [vmem:[%s5321_s6 + $0xe0] sm:$0xff]  ;;  %v3189_v23 = vld [vmem:[%s5321_s6 + $0xf8] sm:$0xff] }
 0x4e8   : > { %v2089_v22 = vld [vmem:[%s5321_s6 + $0x60] sm:$0xff] }
 0x4e9   : > { %v3858_v26 = vpop.f32.mrb[84].mxu1  ;;  %4016 = vmatpush1.bf16.msra.mxu0 %v4015_v24  ;;  %v3825_v45 = vpop.f32.mrb[48].mxu0  ;;  %4043 = vmatpush1.bf16.msra.mxu1 %v4042_v25  ;;  %v2092_v24 = vld [vmem:[%s5321_s6 + $0x78] sm:$0xff]  ;;  %v3188_v25 = vld [vmem:[%s5321_s6 + $0xf0] sm:$0xff] }
 0x4ea   : > { %v2236_v46 = vpop.f32.mrb[85].mxu1  ;;  %4017 = vmatprep.subr.bf16.mxu0 %v4243_v2  ;;  %v2058_v47 = vpop.f32.mrb[49].mxu0  ;;  %4044 = vmatprep.subr.bf16.mxu1 %v4243_v2 }
 0x4eb   : > { %v4018_v48 = vpack.c.bf16 %v3858_v26, %v2236_v46  ;;  %v4045_v49 = vpack.c.bf16 %v3825_v45, %v2058_v47  ;;  %v2091_v26 = vld [vmem:[%s5321_s6 + $0x70] sm:$0xff] }
 0x4ed   : > { %v3861_v52 = vpop.f32.mrb[86].mxu1  ;;  %4019 = vmatpush1.bf16.msra.mxu0 %v4018_v48  ;;  %v3828_v53 = vpop.f32.mrb[50].mxu0  ;;  %4046 = vmatpush1.bf16.msra.mxu1 %v4045_v49 }
 0x4ee   : > { %v2246_v54 = vpop.f32.mrb[87].mxu1  ;;  %4020 = vmatprep.subr.bf16.mxu0 %v4243_v2  ;;  %v2068_v55 = vpop.f32.mrb[51].mxu0  ;;  %4047 = vmatprep.subr.bf16.mxu1 %v4243_v2 }
 0x4ef   : > { %v4021_v57 = vpack.c.bf16 %v3861_v52, %v2246_v54  ;;  %v4048_v58 = vpack.c.bf16 %v3828_v53, %v2068_v55 }
 0x4f1   : > { %4022 = vmatpush1.bf16.msra.mxu0 %v4021_v57  ;;  %4049 = vmatpush1.bf16.msra.mxu1 %v4048_v58 }
 0x4f2   : > { %4051 = vmatprep.subr.bf16.mxu0 %v4050_v56  ;;  %4081 = vmatprep.subr.bf16.mxu1 %v4243_v2 }
 0x4f4   : > { %2361 = vmatmul.mubr.f32.vlgmr.msra.gmra.mrb[52].mxu0 %v3174_v59  ;;  %2490 = vmatmul.mubr.f32.vlgmr.msra.gmra.mrb[88].mxu1 %v2077_v60 }
 0x4f5   : > { %3191 = vmatprep.mubr.msk.f32.mxu0 %vm1513_vm4, %v3177_v61  ;;  %4053 = vmatpush3.bf16.msra.mxu0 %v4050_v56 }
 0x4f6   : > { %3199 = vmatprep.mubr.msk.f32.mxu1 %vm1513_vm4, %v2080_v62  ;;  %3866 = vmatprep.subr.msk.mxu0 %vm371_vm1, %v3208_v63 }
 0x4f8   : > { %2366 = vmatmul.mubr.f32.gmra.mrb[54].mxu0 %v3176_v0  ;;  %2495 = vmatmul.mubr.f32.gmra.mrb[90].mxu1 %v2079_v1 }
 0x4f9   : > { %3192 = vmatprep.mubr.msk.f32.mxu0 %vm1513_vm4, %v3179_v3  ;;  %3200 = vmatprep.mubr.msk.f32.mxu1 %vm1513_vm4, %v2082_v4 }
 0x4fa   : > { %3867 = vmatpush3.msk.msra.mxu0 %vm371_vm1, %v3208_v63 }
 0x4fb   : > { %4054 = vmatprep.subr.bf16.mxu0 %v4243_v2 }
 0x4fc   : > { %2371 = vmatmul.mubr.f32.gmra.mrb[56].mxu0 %v3178_v5  ;;  %2500 = vmatmul.mubr.f32.gmra.mrb[92].mxu1 %v2081_v6 }
 0x4fd   : > { %3193 = vmatprep.mubr.msk.f32.mxu0 %vm1513_vm4, %v3181_v7  ;;  %3201 = vmatprep.mubr.msk.f32.mxu1 %vm1513_vm4, %v2084_v8 }
 0x500   : > { %2376 = vmatmul.mubr.f32.gmra.mrb[58].mxu0 %v3180_v9  ;;  %2505 = vmatmul.mubr.f32.gmra.mrb[94].mxu1 %v2083_v10 }
 0x501   : > { %3194 = vmatprep.mubr.msk.f32.mxu0 %vm1513_vm4, %v3183_v11  ;;  %3202 = vmatprep.mubr.msk.f32.mxu1 %vm1513_vm4, %v2086_v12 }
 0x504   : > { %2381 = vmatmul.mubr.f32.gmra.mrb[60].mxu0 %v3182_v13  ;;  %2510 = vmatmul.mubr.f32.gmra.mrb[96].mxu1 %v2085_v14 }
 0x505   : > { %3195 = vmatprep.mubr.msk.f32.mxu0 %vm1513_vm4, %v3185_v15  ;;  %3203 = vmatprep.mubr.msk.f32.mxu1 %vm1513_vm4, %v2088_v16 }
 0x508   : > { %2386 = vmatmul.mubr.f32.gmra.mrb[62].mxu0 %v3184_v17  ;;  %2515 = vmatmul.mubr.f32.gmra.mrb[98].mxu1 %v2087_v18 }
 0x509   : > { %3196 = vmatprep.mubr.msk.f32.mxu0 %vm1513_vm4, %v3187_v19  ;;  %3204 = vmatprep.mubr.msk.f32.mxu1 %vm1513_vm4, %v2090_v20 }
 0x50c   : > { %2391 = vmatmul.mubr.f32.gmra.mrb[64].mxu0 %v3186_v21  ;;  %2520 = vmatmul.mubr.f32.gmra.mrb[100].mxu1 %v2089_v22 }
 0x50d   : > { %3197 = vmatprep.mubr.msk.f32.mxu0 %vm1513_vm4, %v3189_v23  ;;  %3205 = vmatprep.mubr.msk.f32.mxu1 %vm1513_vm4, %v2092_v24 }
 0x510   : > { %2396 = vmatmul.mubr.f32.gmra.mrb[66].mxu0 %v3188_v25  ;;  %2525 = vmatmul.mubr.f32.gmra.mrb[102].mxu1 %v2091_v26 }
 0x511   : > { %3868 = vmatprep.mubr.msk.f32.mxu0 %vm343_vm2, %v4863_v28  ;;  %v3231_v28 = vld [vmem:[%s5321_s6 + $0x118] sm:$0xff] }
 0x512   : > { %3245 = vmatprep.mubr.msk.f32.mxu1 %vm1513_vm4, %v3231_v28 }
 0x514   : > { %3869 = vmatmul.mubr.msk.f32.vlgmr.msra.gmra.mrb[68].mxu0 %vm343_vm2, %v4861_v27  ;;  %v3229_v27 = vld [vmem:[%s5321_s6 + $0x108] sm:$0xff] }
 0x515   : > { %3871 = vmatprep.mubr.msk.f32.mxu0 %vm343_vm2, %v4875_v30 }
 0x518   : > { %3872 = vmatmul.mubr.msk.f32.gmra.mrb[70].mxu0 %vm343_vm2, %v4873_v29 }
 0x519   : > { %3874 = vmatprep.mubr.msk.f32.mxu0 %vm343_vm2, %v4887_v32 }
 0x51c   : > { %3875 = vmatmul.mubr.msk.f32.gmra.mrb[72].mxu0 %vm343_vm2, %v4885_v31 }
 0x51d   : > { %3877 = vmatprep.mubr.msk.f32.mxu0 %vm343_vm2, %v4899_v34 }
 0x520   : > { %3878 = vmatmul.mubr.msk.f32.gmra.mrb[74].mxu0 %vm343_vm2, %v4897_v33 }
 0x521   : > { %3880 = vmatprep.mubr.msk.f32.mxu0 %vm343_vm2, %v4911_v37 }
 0x524   : > { %3881 = vmatmul.mubr.msk.f32.gmra.mrb[76].mxu0 %vm343_vm2, %v4909_v35 }
 0x525   : > { %3883 = vmatprep.mubr.msk.f32.mxu0 %vm343_vm2, %v4923_v38 }
 0x528   : > { %3884 = vmatmul.mubr.msk.f32.gmra.mrb[78].mxu0 %vm343_vm2, %v4921_v36 }
 0x529   : > { %3886 = vmatprep.mubr.msk.f32.mxu0 %vm343_vm2, %v4935_v40 }
 0x52c   : > { %3887 = vmatmul.mubr.msk.f32.gmra.mrb[80].mxu0 %vm343_vm2, %v4933_v39 }
 0x52d   : > { %3889 = vmatprep.mubr.msk.f32.mxu0 %vm343_vm2, %v4947_v42 }
 0x530   : > { %3890 = vmatmul.mubr.msk.f32.gmra.mrb[82].mxu0 %vm343_vm2, %v4945_v41 }
 0x531   : > { %3892 = vmatprep.mubr.msk.f32.mxu0 %vm343_vm2, %v4959_v44 }
 0x534   : > { %3893 = vmatmul.mubr.msk.f32.gmra.mrb[84].mxu0 %vm343_vm2, %v4957_v43 }
 0x535   : > { %3244 = vmatprep.mubr.msk.f32.mxu0 %vm1513_vm4, %v3229_v27 }
 0x5c7   : > { %v2362_v29 = vpop.f32.mrb[52].mxu0  ;;  %v2491_v30 = vpop.f32.mrb[88].mxu1 }
 0x5c8   : > { %v2364_v31 = vpop.f32.mrb[53].mxu0  ;;  %v5154_v32 = vadd.f32 %v2491_v30, %v2362_v29  ;;  %v2493_v33 = vpop.f32.mrb[89].mxu1 }
 0x5cb   : > { %v2367_v34 = vpop.f32.mrb[54].mxu0  ;;  %v2496_v35 = vpop.f32.mrb[90].mxu1 }
 0x5cc   : > { %v2369_v37 = vpop.f32.mrb[55].mxu0  ;;  %v5156_v36 = vadd.f32 %v2496_v35, %v2367_v34  ;;  %v2498_v38 = vpop.f32.mrb[91].mxu1  ;;  %v3228_v34 = vld [vmem:[%s5321_s6 + $0x100] sm:$0xff]  ;;  %v3230_v35 = vld [vmem:[%s5321_s6 + $0x110] sm:$0xff] }
 0x5cd   : > { %v3233_v37 = vld [vmem:[%s5321_s6 + $0x128] sm:$0xff]  ;;  %v3235_v38 = vld [vmem:[%s5321_s6 + $0x138] sm:$0xff] }
 0x5cf   : > { %v2372_v39 = vpop.f32.mrb[56].mxu0  ;;  %v2501_v40 = vpop.f32.mrb[92].mxu1 }
 0x5d0   : > { %v2374_v41 = vpop.f32.mrb[57].mxu0  ;;  %v5158_v42 = vadd.f32 %v2501_v40, %v2372_v39  ;;  %v2503_v43 = vpop.f32.mrb[93].mxu1  ;;  %v3234_v39 = vld [vmem:[%s5321_s6 + $0x130] sm:$0xff]  ;;  %v3237_v40 = vld [vmem:[%s5321_s6 + $0x148] sm:$0xff] }
 0x5d1   : > { %v3236_v41 = vld [vmem:[%s5321_s6 + $0x140] sm:$0xff]  ;;  %v3239_v43 = vld [vmem:[%s5321_s6 + $0x158] sm:$0xff] }
 0x5d3   : > { %v2377_v44 = vpop.f32.mrb[58].mxu0  ;;  %v2506_v45 = vpop.f32.mrb[94].mxu1 }
 0x5d4   : > { %v2379_v46 = vpop.f32.mrb[59].mxu0  ;;  %v5160_v47 = vadd.f32 %v2506_v45, %v2377_v44  ;;  %v2508_v48 = vpop.f32.mrb[95].mxu1  ;;  %v3238_v44 = vld [vmem:[%s5321_s6 + $0x150] sm:$0xff]  ;;  %v3241_v45 = vld [vmem:[%s5321_s6 + $0x168] sm:$0xff] }
 0x5d5   : > { %v3240_v46 = vld [vmem:[%s5321_s6 + $0x160] sm:$0xff]  ;;  %v3243_v48 = vld [vmem:[%s5321_s6 + $0x178] sm:$0xff] }
 0x5d7   : > { %v2382_v49 = vpop.f32.mrb[60].mxu0  ;;  %v2511_v50 = vpop.f32.mrb[96].mxu1 }
 0x5d8   : > { %v2384_v51 = vpop.f32.mrb[61].mxu0  ;;  %v5162_v52 = vadd.f32 %v2511_v50, %v2382_v49  ;;  %v2513_v53 = vpop.f32.mrb[97].mxu1  ;;  %v3242_v49 = vld [vmem:[%s5321_s6 + $0x170] sm:$0xff] }
 0x5d9   : > { %v2857_v50 = vpop.permute.xlu0 %2856 }
 0x5db   : > { %v2387_v54 = vpop.f32.mrb[62].mxu0  ;;  %v2516_v55 = vpop.f32.mrb[98].mxu1 }
 0x5dc   : > { %v2389_v56 = vpop.f32.mrb[63].mxu0  ;;  %v5164_v57 = vadd.f32 %v2516_v55, %v2387_v54  ;;  %v2518_v58 = vpop.f32.mrb[99].mxu1 }
 0x5df   : > { %v2392_v59 = vpop.f32.mrb[64].mxu0  ;;  %v2521_v60 = vpop.f32.mrb[100].mxu1 }
 0x5e0   : > { %v2394_v61 = vpop.f32.mrb[65].mxu0  ;;  %v5166_v62 = vadd.f32 %v2521_v60, %v2392_v59  ;;  %v2523_v63 = vpop.f32.mrb[101].mxu1 }
 0x5e1   : > { %v2862_v59 = vpop.permute.xlu1 %2861 }
 0x5e3   : > { %v2397_v0 = vpop.f32.mrb[66].mxu0  ;;  %v2526_v1 = vpop.f32.mrb[102].mxu1 }
 0x5e4   : > { %v2399_v3 = vpop.f32.mrb[67].mxu0  ;;  %v5168_v4 = vadd.f32 %v2526_v1, %v2397_v0  ;;  %v2528_v5 = vpop.f32.mrb[103].mxu1 }
 0x5e7   : > { %v3870_v6 = vpop.f32.mrb[68].mxu0 }
 0x5e8   : > { %v2603_v7 = vpop.f32.mrb[69].mxu0 }
 0x5e9   : > { %v4055_v8 = vpack.c.bf16 %v3870_v6, %v2603_v7  ;;  %v2867_v6 = vpop.permute.xlu0 %2866 }
 0x5eb   : > { %v3873_v9 = vpop.f32.mrb[70].mxu0  ;;  %4056 = vmatpush1.bf16.msra.mxu0 %v4055_v8  ;;  %4090 = vmatpush1.bf16.msra.mxu1 %v4055_v8 }
 0x5ec   : > { %v2613_v10 = vpop.f32.mrb[71].mxu0  ;;  %4057 = vmatprep.subr.bf16.mxu0 %v4243_v2  ;;  %4082 = vmatprep.subr.bf16.mxu1 %v4243_v2 }
 0x5ed   : > { %v4058_v11 = vpack.c.bf16 %v3873_v9, %v2613_v10 }
 0x5ef   : > { %v3876_v12 = vpop.f32.mrb[72].mxu0  ;;  %4059 = vmatpush1.bf16.msra.mxu0 %v4058_v11  ;;  %4091 = vmatpush1.bf16.msra.mxu1 %v4058_v11 }
 0x5f0   : > { %v2623_v13 = vpop.f32.mrb[73].mxu0  ;;  %4060 = vmatprep.subr.bf16.mxu0 %v4243_v2  ;;  %4083 = vmatprep.subr.bf16.mxu1 %v4243_v2 }
 0x5f1   : > { %v4061_v14 = vpack.c.bf16 %v3876_v12, %v2623_v13 }
 0x5f3   : > { %v3879_v15 = vpop.f32.mrb[74].mxu0  ;;  %4062 = vmatpush1.bf16.msra.mxu0 %v4061_v14  ;;  %4092 = vmatpush1.bf16.msra.mxu1 %v4061_v14 }
 0x5f4   : > { %v2633_v16 = vpop.f32.mrb[75].mxu0  ;;  %4063 = vmatprep.subr.bf16.mxu0 %v4243_v2  ;;  %4084 = vmatprep.subr.bf16.mxu1 %v4243_v2 }
 0x5f5   : > { %v4064_v17 = vpack.c.bf16 %v3879_v15, %v2633_v16  ;;  %v2877_v15 = vpop.permute.xlu0 %2876 }
 0x5f7   : > { %v3882_v18 = vpop.f32.mrb[76].mxu0  ;;  %4065 = vmatpush1.bf16.msra.mxu0 %v4064_v17  ;;  %4093 = vmatpush1.bf16.msra.mxu1 %v4064_v17 }
 0x5f8   : > { %v2643_v19 = vpop.f32.mrb[77].mxu0  ;;  %4066 = vmatprep.subr.bf16.mxu0 %v4243_v2  ;;  %4085 = vmatprep.subr.bf16.mxu1 %v4243_v2 }
 0x5f9   : > { %v4067_v20 = vpack.c.bf16 %v3882_v18, %v2643_v19 }
 0x5fb   : > { %v3885_v21 = vpop.f32.mrb[78].mxu0  ;;  %4068 = vmatpush1.bf16.msra.mxu0 %v4067_v20  ;;  %4094 = vmatpush1.bf16.msra.mxu1 %v4067_v20 }
 0x5fc   : > { %v2653_v22 = vpop.f32.mrb[79].mxu0  ;;  %4069 = vmatprep.subr.bf16.mxu0 %v4243_v2  ;;  %4086 = vmatprep.subr.bf16.mxu1 %v4243_v2 }
 0x5fd   : > { %v4070_v23 = vpack.c.bf16 %v3885_v21, %v2653_v22 }
 0x5ff   : > { %v3888_v24 = vpop.f32.mrb[80].mxu0  ;;  %4071 = vmatpush1.bf16.msra.mxu0 %v4070_v23  ;;  %4095 = vmatpush1.bf16.msra.mxu1 %v4070_v23 }
 0x600   : > { %v2663_v25 = vpop.f32.mrb[81].mxu0  ;;  %4072 = vmatprep.subr.bf16.mxu0 %v4243_v2  ;;  %4087 = vmatprep.subr.bf16.mxu1 %v4243_v2 }
 0x601   : > { %v4073_v26 = vpack.c.bf16 %v3888_v24, %v2663_v25  ;;  %v2887_v25 = vpop.permute.xlu0 %2886 }
 0x603   : > { %v3891_v27 = vpop.f32.mrb[82].mxu0  ;;  %4074 = vmatpush1.bf16.msra.mxu0 %v4073_v26  ;;  %4096 = vmatpush1.bf16.msra.mxu1 %v4073_v26 }
 0x604   : > { %v2673_v28 = vpop.f32.mrb[83].mxu0  ;;  %4075 = vmatprep.subr.bf16.mxu0 %v4243_v2  ;;  %4088 = vmatprep.subr.bf16.mxu1 %v4243_v2 }
 0x605   : > { %v4076_v29 = vpack.c.bf16 %v3891_v27, %v2673_v28 }
 0x607   : > { %v3894_v30 = vpop.f32.mrb[84].mxu0  ;;  %4077 = vmatpush1.bf16.msra.mxu0 %v4076_v29  ;;  %4097 = vmatpush1.bf16.msra.mxu1 %v4076_v29 }
 0x608   : > { %v2683_v31 = vpop.f32.mrb[85].mxu0  ;;  %4078 = vmatprep.subr.bf16.mxu0 %v4243_v2  ;;  %4089 = vmatprep.subr.bf16.mxu1 %v4243_v2  ;;  %v3232_v2 = vld [vmem:[%s5321_s6 + $0x120] sm:$0xff] }
 0x609   : > { %v4079_v33 = vpack.c.bf16 %v3894_v30, %v2683_v31 }
 0x60b   : > { %4080 = vmatpush1.bf16.msra.mxu0 %v4079_v33  ;;  %4098 = vmatpush1.bf16.msra.mxu1 %v4079_v33 }
 0x60e   : > { %2798 = vmatmul.mubr.f32.vlgmr.msra.gmra.mrb[86].mxu0 %v3228_v34  ;;  %2803 = vmatmul.mubr.f32.vlgmr.msra.gmra.mrb[104].mxu1 %v3230_v35 }
 0x60f   : > { %3246 = vmatprep.mubr.msk.f32.mxu1 %vm1513_vm4, %v3233_v37 }
 0x612   : > { %2808 = vmatmul.mubr.f32.gmra.mrb[106].mxu1 %v3232_v2 }
 0x613   : > { %3247 = vmatprep.mubr.msk.f32.mxu1 %vm1513_vm4, %v3235_v38 }
 0x616   : > { %2813 = vmatmul.mubr.f32.gmra.mrb[108].mxu1 %v3234_v39 }
 0x617   : > { %3248 = vmatprep.mubr.msk.f32.mxu1 %vm1513_vm4, %v3237_v40 }
 0x61a   : > { %2818 = vmatmul.mubr.f32.gmra.mrb[110].mxu1 %v3236_v41 }
 0x61b   : > { %3249 = vmatprep.mubr.msk.f32.mxu1 %vm1513_vm4, %v3239_v43 }
 0x61e   : > { %2823 = vmatmul.mubr.f32.gmra.mrb[112].mxu1 %v3238_v44 }
 0x61f   : > { %3250 = vmatprep.mubr.msk.f32.mxu1 %vm1513_vm4, %v3241_v45 }
 0x622   : > { %2828 = vmatmul.mubr.f32.gmra.mrb[114].mxu1 %v3240_v46 }
 0x623   : > { %3251 = vmatprep.mubr.msk.f32.mxu1 %vm1513_vm4, %v3243_v48 }
 0x626   : > { %2833 = vmatmul.mubr.f32.gmra.mrb[116].mxu1 %v3242_v49 }
 0x6e1   : > { %v2799_v51 = vpop.f32.mrb[86].mxu0  ;;  %v2804_v53 = vpop.f32.mrb[104].mxu1 }
 0x6e2   : > { %v2838_v54 = vadd.f32 %v2799_v51, %v5154_v32  ;;  %v2839_v55 = vadd.f32 %v2804_v53, %v5156_v36  ;;  %v2806_v56 = vpop.f32.mrb[105].mxu1  ;;  %v2801_v58 = vpop.f32.mrb[87].mxu0 }
 0x6e4   : > { %v2894_v60 = vadd.f32 %v2857_v50, %v2838_v54  ;;  %v2895_v61 = vadd.f32 %v2862_v59, %v2839_v55 }
 0x6e5   : > { %v2809_v63 = vpop.f32.mrb[106].mxu1 }
 0x6e6   : > { %v2902_v0 = vmax.f32 %v2894_v60, 0.0  ;;  %v2903_v1 = vmax.f32 %v2895_v61, 0.0  ;;  %v2840_v3 = vadd.f32 %v2809_v63, %v5158_v42  ;;  %v2811_v5 = vpop.f32.mrb[107].mxu1  ;;  %v2872_v42 = vpop.permute.xlu1 %2871 }
 0x6e8   : > { %2911 = vst.msk [vmem:[%s5240_s17] sm:$0xff] %vm2910_vm5, %v2902_v0  ;;  %2912 = vst.msk [vmem:[%s5240_s17 + $0x8] sm:$0xff] %vm2910_vm5, %v2903_v1  ;;  %v2896_v32 = vadd.f32 %v2867_v6, %v2840_v3 }
 0x6e9   : > { %v2814_v36 = vpop.f32.mrb[108].mxu1 }
 0x6ea   : > { %v2904_v7 = vmax.f32 %v2896_v32, 0.0  ;;  %v2841_v8 = vadd.f32 %v2814_v36, %v5160_v47  ;;  %v2816_v9 = vpop.f32.mrb[109].mxu1  ;;  %v2882_v20 = vpop.permute.xlu1 %2881 }
 0x6ec   : > { %2913 = vst.msk [vmem:[%s5240_s17 + $0x10] sm:$0xff] %vm2910_vm5, %v2904_v7  ;;  %v2897_v10 = vadd.f32 %v2872_v42, %v2841_v8 }
 0x6ed   : > { %v2819_v11 = vpop.f32.mrb[110].mxu1 }
 0x6ee   : > { %v2905_v12 = vmax.f32 %v2897_v10, 0.0  ;;  %v2842_v13 = vadd.f32 %v2819_v11, %v5162_v52  ;;  %v2821_v14 = vpop.f32.mrb[111].mxu1  ;;  %v2892_v30 = vpop.permute.xlu1 %2891 }
 0x6f0   : > { %2914 = vst.msk [vmem:[%s5240_s17 + $0x18] sm:$0xff] %vm2910_vm5, %v2905_v12  ;;  %v2898_v16 = vadd.f32 %v2877_v15, %v2842_v13 }
 0x6f1   : > { %v2824_v17 = vpop.f32.mrb[112].mxu1 }
 0x6f2   : > { %v2906_v18 = vmax.f32 %v2898_v16, 0.0  ;;  %v2843_v47 = vadd.f32 %v2824_v17, %v5164_v57  ;;  %v2826_v19 = vpop.f32.mrb[113].mxu1 }
 0x6f4   : > { %2915 = vst.msk [vmem:[%s5240_s17 + $0x20] sm:$0xff] %vm2910_vm5, %v2906_v18  ;;  %v2899_v21 = vadd.f32 %v2882_v20, %v2843_v47 }
 0x6f5   : > { %v2829_v22 = vpop.f32.mrb[114].mxu1 }
 0x6f6   : > { %v2907_v52 = vmax.f32 %v2899_v21, 0.0  ;;  %v2844_v23 = vadd.f32 %v2829_v22, %v5166_v62  ;;  %v2831_v24 = vpop.f32.mrb[115].mxu1 }
 0x6f8   : > { %2916 = vst.msk [vmem:[%s5240_s17 + $0x28] sm:$0xff] %vm2910_vm5, %v2907_v52  ;;  %v2900_v26 = vadd.f32 %v2887_v25, %v2844_v23 }
 0x6f9   : > { %v2834_v57 = vpop.f32.mrb[116].mxu1 }
 0x6fa   : > { %v2908_v27 = vmax.f32 %v2900_v26, 0.0  ;;  %v2845_v28 = vadd.f32 %v2834_v57, %v5168_v4  ;;  %v2836_v29 = vpop.f32.mrb[117].mxu1 }
 0x6fc   : > { %2917 = vst.msk [vmem:[%s5240_s17 + $0x30] sm:$0xff] %vm2910_vm5, %v2908_v27  ;;  %v2901_v31 = vadd.f32 %v2892_v30, %v2845_v28 }
 0x6fe   : > { %v2909_v62 = vmax.f32 %v2901_v31, 0.0 }
 0x700   : > { %2918 = vst.msk [vmem:[%s5240_s17 + $0x38] sm:$0xff] %vm2910_vm5, %v2909_v62 }
 0x701   : > { %4192 = shalt.err (!%p4189_p3)
}
 0x702   : > { %s4193_s29 = scalar_lea.hbm %s5266_s25, 1024  ;;  %s4197_s21 = scalar_lea.hbm %s5324_s9, 2048 }
 0x703   : > { %p4194_p4 = scmp.ne.s32.totalorder %s5266_s25, %s4193_s29  ;;  %p4198_p9 = scmp.lt.u32.totalorder %s5266_s25, %s5324_s9 }
 0x704   : > { %p4199_p10 = scmp.lt.u32.totalorder %s4197_s21, %s4193_s29  ;;  %p4201_p12 = scmp.lt.u32.totalorder %s4193_s29, %s5266_s25 }
 0x705   : > { %p4195_p7 = pnand %p4194_p4, %p4338_p5 }
 0x706   : > { %p4200_p11 = por %p4199_p10, %p4198_p9 }
 0x707   : > { %p4196_p8 = pneg %p4195_p7 }
 0x708   : > { %p4202_p13 = por %p4201_p12, %p4200_p11 }
 0x70a   : > { %p4203_p0 = pnand %p4202_p13, %p4196_p8 }
 0x70c   : > { %4206 = shalt.err (!%p4203_p0)
}
 0x70d   : > { %s4248_s26 = smov 128   ;;  %s4249_s27 = smov 8  }
 0x70e   : > { %4132 = dma.vmem_to_hbm [thread:$0]  (%p4338_p5), %s5268_s22, 1024, %s5266_s25, %s5274_s13, %s4248_s26, %s4248_s26, %s4249_s27  }
 0x70f PF: > { %p4138_p1 = scmp.ge.s32.totalorder %s4241_s12, 2  ;;  %s2948_s28 = sand.u32 1, %s4229_s30  }
 0x710   : > { %s2949_s14 = scalar_lea.sflag [#allocation3], %s2948_s28 }
 0x711   : > { %p4135_p2 = pnand %p4138_p1, %p4342_p6 }
 0x713   : > { %4224 = dma.done.wait (!%p4135_p2), %s2949_s14, 1024  }
 0x714   : > { %4226 = vsyncadd (!%p4135_p2), %s2949_s14, 4294966272  ;;  %p19_p3 = scmp.ge.s32.totalorder %s4325_s15, 4   ;;  %s5327_s30 = smov %s4233_s10 }
 0x715   : > { %s5328_s10 = smov %s4237_s11  ;;  %s5329_s11 = smov %s4336_s18 }
 0x716   : > { %s5330_s12 = smov %s4325_s15  ;;  %21 = sbr.rel (!%p19_p3) target bundleno = 3 (0x3), region = 99 }
 0x71d   :  { %2954 = vsyncpa [#allocation3], 1 }
 0x71e   :  { %2956 = vsyncpa [#allocation3 + $0x1], 1 }

</bundles_post_ra>
